<compile_context>
chip_gen: v7x
topology: tpu7x:2x2x1
jax: 0.10.0
libtpu: 0.0.40
codegen_flags: <defaults>
</compile_context>

<pallas_src>
import functools

import jax
import jax.numpy as jnp
import numpy as np
from jax.experimental import pallas as pl
from jax.experimental.pallas import tpu as pltpu


_VMEM_LIMIT_BYTES = 48 * 1024 * 1024   # safe on v5e/v6e (128 MiB) and v7x (64 MiB)
_VMEM_TILE_BUDGET = 28 * 1024 * 1024   # budget used when picking the row tile


def _round_up(x, m):
    return ((x + m - 1) // m) * m


def _pick_tm(m, kdp, cp, itemsize):
    """Pick the row tile: as large as fits the VMEM budget (double-buffered
    patches/weights/output), capped so we do not pad M far past its size."""
    tm = 128
    for cand in (2048, 1024, 512, 256, 128):
        need = (2 * cand * kdp * itemsize        # patch tile, double buffered
                + 2 * kdp * cp * itemsize        # weight block (conservatively x2)
                + 2 * cand * cp * 4              # f32 output tile, double buffered
                + 2 * cand * cp * 4)             # f32 matmul / elementwise temps
        if need <= _VMEM_TILE_BUDGET:
            tm = cand
            break
    return min(tm, _round_up(m, 128))


# ----------------------------------------------------------------------------
# Pallas kernels
# ----------------------------------------------------------------------------
def _make_conv_stats_kernel(tm, m_true):
    """Pass 1: conv matmul fused with per-channel statistics.

    The conv output is only needed for mean/var, so it is never written to HBM.
    Accumulates S1 = sum(out - c), S2 = sum((out - c)^2) with c = first-tile
    mean (shifted/centered variance; any constant shift is mathematically
    valid and keeps S2 well conditioned)."""
    need_mask = (m_true % tm) != 0

    def kernel(p_ref, w_ref, c_ref, s1_ref, s2_ref):
        i = pl.program_id(0)
        out = jnp.dot(p_ref[...], w_ref[...],
                      preferred_element_type=jnp.float32)          # [tm, Cp] f32

        @pl.when(i == 0)
        def _():
            c_ref[...] = jnp.sum(out, axis=0, keepdims=True) * (1.0 / tm)
            s1_ref[...] = jnp.zeros_like(s1_ref)
            s2_ref[...] = jnp.zeros_like(s2_ref)

        xc = out - c_ref[...]
        if need_mask:
            # Exclude zero-padded rows of the last tile from the statistics.
            rows = i * tm + jax.lax.broadcasted_iota(jnp.int32, (tm, 1), 0)
            xc = jnp.where(rows < m_true, xc, 0.0)
        s1_ref[...] += jnp.sum(xc, axis=0, keepdims=True)
        s2_ref[...] += jnp.sum(xc * xc, axis=0, keepdims=True)

    return kernel


def _matmul_bias_kernel(p_ref, w_ref, b_ref, o_ref):
    """Pass 2: one row tile of o = p @ w + b (bias broadcast over rows)."""
    acc = jnp.dot(p_ref[...], w_ref[...], preferred_element_type=jnp.float32)
    o_ref[...] = (acc + b_ref[...]).astype(o_ref.dtype)


# ----------------------------------------------------------------------------
# Pallas wrappers
# ----------------------------------------------------------------------------
def _conv_channel_stats(patches_p, w_p, m_true, tm):
    """patches_p: [Mp, Kdp], w_p: [Kdp, Cp] -> (shift, S1, S2), each [Cp] f32."""
    mp, kdp = patches_p.shape
    cp = w_p.shape[1]
    c, s1, s2 = pl.pallas_call(
        _make_conv_stats_kernel(tm, m_true),
        out_shape=(jax.ShapeDtypeStruct((1, cp), jnp.float32),
                   jax.ShapeDtypeStruct((1, cp), jnp.float32),
                   jax.ShapeDtypeStruct((1, cp), jnp.float32)),
        grid=(mp // tm,),
        in_specs=[
            pl.BlockSpec((tm, kdp), lambda i: (i, 0)),
            pl.BlockSpec((kdp, cp), lambda i: (0, 0)),
        ],
        out_specs=(
            pl.BlockSpec((1, cp), lambda i: (0, 0)),
            pl.BlockSpec((1, cp), lambda i: (0, 0)),
            pl.BlockSpec((1, cp), lambda i: (0, 0)),
        ),
        compiler_params=pltpu.CompilerParams(
            dimension_semantics=("arbitrary",),          # reduction over M
            vmem_limit_bytes=_VMEM_LIMIT_BYTES),
    )(patches_p, w_p)
    return c[0], s1[0], s2[0]


def _conv_bias(patches_p, w_p, bias_p, tm):
    """patches_p: [Mp, Kdp], w_p: [Kdp, Cp], bias_p: [1, Cp] -> [Mp, Cp] f32."""
    mp, kdp = patches_p.shape
    cp = w_p.shape[1]
    return pl.pallas_call(
        _matmul_bias_kernel,
        out_shape=jax.ShapeDtypeStruct((mp, cp), jnp.float32),
        grid=(mp // tm,),
        in_specs=[
            pl.BlockSpec((tm, kdp), lambda i: (i, 0)),
            pl.BlockSpec((kdp, cp), lambda i: (0, 0)),
            pl.BlockSpec((1, cp), lambda i: (0, 0)),
        ],
        out_specs=pl.BlockSpec((tm, cp), lambda i: (i, 0)),
        compiler_params=pltpu.CompilerParams(
            dimension_semantics=("parallel",),
            vmem_limit_bytes=_VMEM_LIMIT_BYTES),
    )(patches_p, w_p, bias_p)


# ----------------------------------------------------------------------------
# Plain-JAX glue
# ----------------------------------------------------------------------------
def _im2col(x, kh, kw, stride, padding, dilation):
    """x: [N, Cin, H, W] -> patches [N*OH*OW, Cin*KH*KW] (Cin-major, (kh,kw)-minor,
    matching PyTorch weight.reshape(Cout, -1))."""
    n, cin, h, w = x.shape
    oh = (h + 2 * padding - dilation * (kh - 1) - 1) // stride + 1
    ow = (w + 2 * padding - dilation * (kw - 1) - 1) // stride + 1
    xp = jnp.pad(x, ((0, 0), (0, 0), (padding, padding), (padding, padding)))
    cols = []
    for i in range(kh):
        for j in range(kw):
            hs = i * dilation
            ws = j * dilation
            cols.append(
                xp[:, :, hs:hs + (oh - 1) * stride + 1:stride,
                         ws:ws + (ow - 1) * stride + 1:stride])   # [N, Cin, OH, OW]
    p = jnp.stack(cols, axis=2)                       # [N, Cin, KH*KW, OH, OW]
    p = p.reshape(n, cin * kh * kw, oh, ow)           # Cin-major, kernel-minor
    p = p.transpose(0, 2, 3, 1).reshape(n * oh * ow, cin * kh * kw)
    return p, oh, ow


def _fix_quantize(x, bitwidth=8):
    """nics_fix_pt-style FIX_AUTO quantization (synthetic deterministic cfg):
    dynamic scale = ceil(log2(max|x|)), step = 2^(scale-(bitwidth-1)),
    round-to-nearest, symmetric clamp (matches the in-script reference)."""
    maxabs = jnp.max(jnp.abs(x))
    scale = jnp.ceil(jnp.log2(jnp.maximum(maxabs, jnp.float32(1e-12))))
    step = jnp.exp2(scale - (bitwidth - 1))
    lim = (2.0 ** (bitwidth - 1)) * step
    return jnp.clip(jnp.round(x / step) * step, -lim, lim)


@functools.partial(jax.jit,
                   static_argnames=("stride", "padding", "dilation", "eps", "use_bf16"))
def convbn_fix_forward(x, conv_weight, bn_gamma, bn_beta,
                       stride=1, padding=1, dilation=1, eps=1e-5, use_bf16=False):
    n, cin, h, w = x.shape
    cout, _, kh, kw = conv_weight.shape
    kd = cin * kh * kw

    # im2col done once in plain JAX; the padded patch tensor is shared by both
    # Pallas convs (padded exactly once).
    patches, oh, ow = _im2col(x, kh, kw, stride, padding, dilation)   # [M, Kd]
    m = n * oh * ow

    compute_dtype = jnp.bfloat16 if use_bf16 else jnp.float32
    itemsize = 2 if use_bf16 else 4

    # Lane/MXU-friendly padding: Cout and Kd to multiples of 128, M to the tile.
    cp = _round_up(cout, 128)
    kdp = _round_up(kd, 128)
    tm = _pick_tm(m, kdp, cp, itemsize)
    mp = _round_up(m, tm)

    patches_p = jnp.pad(patches, ((0, mp - m), (0, kdp - kd))).astype(compute_dtype)

    w_flat_t = conv_weight.reshape(cout, -1).T                        # [Kd, Cout]
    w1_p = jnp.pad(w_flat_t, ((0, kdp - kd), (0, cp - cout))).astype(compute_dtype)

    # Pass 1: conv fused with channel stats (the conv output never hits HBM).
    shift, s1, s2 = _conv_channel_stats(patches_p, w1_p, m, tm)
    shift, s1, s2 = shift[:cout], s1[:cout], s2[:cout]
    mean = shift + s1 / m
    var = (s2 - s1 * s1 / m) / (m - 1)          # unbiased, matches torch.var

    # Fold BN into conv params and quantize (tiny param math, plain JAX).
    inv = bn_gamma / jnp.sqrt(var + eps)
    comb_weight = conv_weight * inv.reshape(-1, 1, 1, 1)
    comb_bias = bn_beta + (0.0 - mean) * inv                          # conv bias is 0.0
    comb_weight = _fix_quantize(comb_weight)
    comb_bias = _fix_quantize(comb_bias)

    # Pass 2: conv with folded+quantized params and bias.
    w2 = comb_weight.reshape(cout, -1).T
    w2_p = jnp.pad(w2, ((0, kdp - kd), (0, cp - cout))).astype(compute_dtype)
    bias_p = jnp.pad(comb_bias.reshape(1, cout).astype(jnp.float32),
                     ((0, 0), (0, cp - cout)))
    out2 = _conv_bias(patches_p, w2_p, bias_p, tm)                    # [Mp, Cp]

    out2 = out2[:m, :cout]
    convbn_out = out2.reshape(n, oh, ow, cout).transpose(0, 3, 1, 2)  # NCHW
    return convbn_out, comb_weight, comb_bias


# ----------------------------------------------------------------------------
# Reference (pure JAX, no Pallas) for the correctness check
# ----------------------------------------------------------------------------
def _reference(x, conv_weight, bn_gamma, bn_beta, stride, padding, dilation, eps):
    dn = jax.lax.conv_dimension_numbers(x.shape, conv_weight.shape,
                                        ("NCHW", "OIHW", "NCHW"))
    conv = lambda w, b: jax.lax.conv_general_dilated(
        x, w, (stride, stride), [(padding, padding)] * 2,
        rhs_dilation=(dilation, dilation), dimension_numbers=dn,
        precision=jax.lax.Precision.HIGHEST) + b.reshape(1, -1, 1, 1)
    out = conv(conv_weight, jnp.zeros_like(bn_beta))
    mean = jnp.mean(out, axis=(0, 2, 3))
    var = jnp.var(out, axis=(0, 2, 3), ddof=1)   # unbiased, as torch.var
    inv = bn_gamma / jnp.sqrt(var + eps)
    cw = _fix_quantize(conv_weight * inv.reshape(-1, 1, 1, 1))
    cb = _fix_quantize(bn_beta - mean * inv)
    return conv(cw, cb)


if __name__ == "__main__":
    key = jax.random.PRNGKey(0)
    k_x, k_w, k_g, k_b = jax.random.split(key, 4)

    # Small shapes consistent with the module: batch=2, in=4, out=8, 16x16, k=3, pad=1.
    N, Cin, H, W = 2, 4, 16, 16
    Cout, KH, KW = 8, 3, 3
    stride, padding, dilation, eps = 1, 1, 1, 1e-5

    x = jax.random.normal(k_x, (N, Cin, H, W), dtype=jnp.float32)
    conv_weight = 0.1 * jax.random.normal(k_w, (Cout, Cin, KH, KW), dtype=jnp.float32)
    bn_gamma = 1.0 + 0.1 * jax.random.normal(k_g, (Cout,), dtype=jnp.float32)
    bn_beta = 0.1 * jax.random.normal(k_b, (Cout,), dtype=jnp.float32)

    # f32 path (default; exact match to the f32 reference).
    out, comb_w, comb_b = convbn_fix_forward(
        x, conv_weight, bn_gamma, bn_beta,
        stride=stride, padding=padding, dilation=dilation, eps=eps)
    out = jax.block_until_ready(out)

    ref = _reference(x, conv_weight, bn_gamma, bn_beta, stride, padding, dilation, eps)
    np.testing.assert_allclose(np.asarray(out), np.asarray(ref), rtol=2e-3, atol=2e-3)

    # bf16-input MXU path (recommended on v6e/v7x); f32 accumulation and stats.
    out_bf16, _, _ = convbn_fix_forward(
        x, conv_weight, bn_gamma, bn_beta,
        stride=stride, padding=padding, dilation=dilation, eps=eps, use_bf16=True)
    out_bf16 = jax.block_until_ready(out_bf16)
    assert np.all(np.isfinite(np.asarray(out_bf16)))
    np.testing.assert_allclose(np.asarray(out_bf16), np.asarray(ref), rtol=1e-1, atol=1e-1)

    print("KERNEL_OK")
</pallas_src>

<mosaic_0001>
module attributes {stable_mosaic.version = 11 : i64} {
  func.func @kernel(%arg0: i32, %arg1: memref<512x128xf32, #tpu.memory_space<vmem>>, %arg2: memref<128x128xf32, #tpu.memory_space<vmem>>, %arg3: memref<1x128xf32, #tpu.memory_space<vmem>>, %arg4: memref<1x128xf32, #tpu.memory_space<vmem>>, %arg5: memref<1x128xf32, #tpu.memory_space<vmem>>) attributes {dimension_semantics = [#tpu.dimension_semantics<arbitrary>], iteration_bounds = array<i64: 1>, scalar_prefetch = 0 : i64, scratch_operands = 0 : i64, tpu.core_type = #tpu.core_type<tc>, window_params = [{transform_indices = @transform_0, window_bounds = array<i64: 512, 128>}, {pipeline_mode = #tpu.pipeline_mode<synchronous>, transform_indices = @transform_1, window_bounds = array<i64: 128, 128>}, {pipeline_mode = #tpu.pipeline_mode<synchronous>, transform_indices = @transform_2, window_bounds = array<i64: 1, 128>}, {pipeline_mode = #tpu.pipeline_mode<synchronous>, transform_indices = @transform_3, window_bounds = array<i64: 1, 128>}, {pipeline_mode = #tpu.pipeline_mode<synchronous>, transform_indices = @transform_4, window_bounds = array<i64: 1, 128>}]} {
    %c0 = arith.constant 0 : index
    %c0_0 = arith.constant 0 : index
    %0 = vector.load %arg1[%c0, %c0_0] : memref<512x128xf32, #tpu.memory_space<vmem>>, vector<512x128xf32>
    %c0_1 = arith.constant 0 : index
    %c0_2 = arith.constant 0 : index
    %1 = vector.load %arg2[%c0_1, %c0_2] : memref<128x128xf32, #tpu.memory_space<vmem>>, vector<128x128xf32>
    %cst = arith.constant dense<0.000000e+00> : vector<512x128xf32>
    %2 = tpu.matmul %0, %1, %cst {dimension_numbers = #tpu.dot_dimension_numbers<[1], [0], [0], [1], [0, 0, 1, 1], [], []>} : vector<512x128xf32>, vector<128x128xf32>, vector<512x128xf32> -> vector<512x128xf32>
    %c0_i32 = arith.constant 0 : i32
    %3 = arith.cmpi eq, %arg0, %c0_i32 : i32
    %4 = arith.extui %3 : i1 to i32
    %c0_i32_3 = arith.constant 0 : i32
    %5 = arith.cmpi ne, %4, %c0_i32_3 : i32
    scf.if %5 {
      %cst_16 = arith.constant dense<0.000000e+00> : vector<128xf32>
      %20 = vector.multi_reduction <add>, %2, %cst_16 [0] : vector<512x128xf32> to vector<128xf32>
      %21 = vector.shape_cast %20 : vector<128xf32> to vector<1x128xf32>
      %cst_17 = arith.constant 0.001953125 : f32
      %22 = vector.broadcast %cst_17 : f32 to vector<1x128xf32>
      %23 = arith.mulf %21, %22 : vector<1x128xf32>
      %c0_18 = arith.constant 0 : index
      %c0_19 = arith.constant 0 : index
      %24 = vector.load %arg3[%c0_18, %c0_19] : memref<1x128xf32, #tpu.memory_space<vmem>>, vector<1x128xf32>
      tpu.vector_store %arg3[%c0_18, %c0_19], %23 {strides = array<i32>} : memref<1x128xf32, #tpu.memory_space<vmem>>, vector<1x128xf32>,
      %cst_20 = arith.constant 0.000000e+00 : f32
      %25 = vector.broadcast %cst_20 : f32 to vector<1x128xf32>
      %c0_21 = arith.constant 0 : index
      %c0_22 = arith.constant 0 : index
      %26 = vector.load %arg4[%c0_21, %c0_22] : memref<1x128xf32, #tpu.memory_space<vmem>>, vector<1x128xf32>
      tpu.vector_store %arg4[%c0_21, %c0_22], %25 {strides = array<i32>} : memref<1x128xf32, #tpu.memory_space<vmem>>, vector<1x128xf32>,
      %cst_23 = arith.constant 0.000000e+00 : f32
      %27 = vector.broadcast %cst_23 : f32 to vector<1x128xf32>
      %c0_24 = arith.constant 0 : index
      %c0_25 = arith.constant 0 : index
      %28 = vector.load %arg5[%c0_24, %c0_25] : memref<1x128xf32, #tpu.memory_space<vmem>>, vector<1x128xf32>
      tpu.vector_store %arg5[%c0_24, %c0_25], %27 {strides = array<i32>} : memref<1x128xf32, #tpu.memory_space<vmem>>, vector<1x128xf32>,
    } else {
    }
    %c0_4 = arith.constant 0 : index
    %c0_5 = arith.constant 0 : index
    %6 = vector.load %arg3[%c0_4, %c0_5] : memref<1x128xf32, #tpu.memory_space<vmem>>, vector<1x128xf32>
    %7 = vector.broadcast %6 : vector<1x128xf32> to vector<512x128xf32>
    %8 = arith.subf %2, %7 : vector<512x128xf32>
    %c0_6 = arith.constant 0 : index
    %c0_7 = arith.constant 0 : index
    %9 = vector.load %arg4[%c0_6, %c0_7] : memref<1x128xf32, #tpu.memory_space<vmem>>, vector<1x128xf32>
    %cst_8 = arith.constant dense<0.000000e+00> : vector<128xf32>
    %10 = vector.multi_reduction <add>, %8, %cst_8 [0] : vector<512x128xf32> to vector<128xf32>
    %11 = vector.shape_cast %10 : vector<128xf32> to vector<1x128xf32>
    %12 = arith.addf %9, %11 : vector<1x128xf32>
    %c0_9 = arith.constant 0 : index
    %c0_10 = arith.constant 0 : index
    %13 = vector.load %arg4[%c0_9, %c0_10] : memref<1x128xf32, #tpu.memory_space<vmem>>, vector<1x128xf32>
    tpu.vector_store %arg4[%c0_9, %c0_10], %12 {strides = array<i32>} : memref<1x128xf32, #tpu.memory_space<vmem>>, vector<1x128xf32>,
    %c0_11 = arith.constant 0 : index
    %c0_12 = arith.constant 0 : index
    %14 = vector.load %arg5[%c0_11, %c0_12] : memref<1x128xf32, #tpu.memory_space<vmem>>, vector<1x128xf32>
    %15 = arith.mulf %8, %8 : vector<512x128xf32>
    %cst_13 = arith.constant dense<0.000000e+00> : vector<128xf32>
    %16 = vector.multi_reduction <add>, %15, %cst_13 [0] : vector<512x128xf32> to vector<128xf32>
    %17 = vector.shape_cast %16 : vector<128xf32> to vector<1x128xf32>
    %18 = arith.addf %14, %17 : vector<1x128xf32>
    %c0_14 = arith.constant 0 : index
    %c0_15 = arith.constant 0 : index
    %19 = vector.load %arg5[%c0_14, %c0_15] : memref<1x128xf32, #tpu.memory_space<vmem>>, vector<1x128xf32>
    tpu.vector_store %arg5[%c0_14, %c0_15], %18 {strides = array<i32>} : memref<1x128xf32, #tpu.memory_space<vmem>>, vector<1x128xf32>,
    return
  }
  func.func @transform_0(%arg0: i32) -> (i32, i32) {
    %c0_i32 = arith.constant 0 : i32
    %c0_i32_0 = arith.constant 0 : i32
    return %arg0, %c0_i32 : i32, i32
  }
  func.func @transform_1(%arg0: i32) -> (i32, i32) {
    %c0_i32 = arith.constant 0 : i32
    %c0_i32_0 = arith.constant 0 : i32
    %c0_i32_1 = arith.constant 0 : i32
    return %c0_i32, %c0_i32_0 : i32, i32
  }
  func.func @transform_2(%arg0: i32) -> (i32, i32) {
    %c0_i32 = arith.constant 0 : i32
    %c0_i32_0 = arith.constant 0 : i32
    %c0_i32_1 = arith.constant 0 : i32
    return %c0_i32, %c0_i32_0 : i32, i32
  }
  func.func @transform_3(%arg0: i32) -> (i32, i32) {
    %c0_i32 = arith.constant 0 : i32
    %c0_i32_0 = arith.constant 0 : i32
    %c0_i32_1 = arith.constant 0 : i32
    return %c0_i32, %c0_i32_0 : i32, i32
  }
  func.func @transform_4(%arg0: i32) -> (i32, i32) {
    %c0_i32 = arith.constant 0 : i32
    %c0_i32_0 = arith.constant 0 : i32
    %c0_i32_1 = arith.constant 0 : i32
    return %c0_i32, %c0_i32_0 : i32, i32
  }
}

module attributes {stable_mosaic.version = 11 : i64} {
  func.func @_matmul_bias_kernel(%arg0: i32, %arg1: memref<512x128xf32, #tpu.memory_space<vmem>>, %arg2: memref<128x128xf32, #tpu.memory_space<vmem>>, %arg3: memref<1x128xf32, #tpu.memory_space<vmem>>, %arg4: memref<512x128xf32, #tpu.memory_space<vmem>>) attributes {dimension_semantics = [#tpu.dimension_semantics<parallel>], iteration_bounds = array<i64: 1>, scalar_prefetch = 0 : i64, scratch_operands = 0 : i64, tpu.core_type = #tpu.core_type<tc>, window_params = [{transform_indices = @transform_0, window_bounds = array<i64: 512, 128>}, {pipeline_mode = #tpu.pipeline_mode<synchronous>, transform_indices = @transform_1, window_bounds = array<i64: 128, 128>}, {pipeline_mode = #tpu.pipeline_mode<synchronous>, transform_indices = @transform_2, window_bounds = array<i64: 1, 128>}, {transform_indices = @transform_3, window_bounds = array<i64: 512, 128>}]} {
    %c0 = arith.constant 0 : index
    %c0_0 = arith.constant 0 : index
    %0 = vector.load %arg1[%c0, %c0_0] : memref<512x128xf32, #tpu.memory_space<vmem>>, vector<512x128xf32>
    %c0_1 = arith.constant 0 : index
    %c0_2 = arith.constant 0 : index
    %1 = vector.load %arg2[%c0_1, %c0_2] : memref<128x128xf32, #tpu.memory_space<vmem>>, vector<128x128xf32>
    %cst = arith.constant dense<0.000000e+00> : vector<512x128xf32>
    %2 = tpu.matmul %0, %1, %cst {dimension_numbers = #tpu.dot_dimension_numbers<[1], [0], [0], [1], [0, 0, 1, 1], [], []>} : vector<512x128xf32>, vector<128x128xf32>, vector<512x128xf32> -> vector<512x128xf32>
    %c0_3 = arith.constant 0 : index
    %c0_4 = arith.constant 0 : index
    %3 = vector.load %arg3[%c0_3, %c0_4] : memref<1x128xf32, #tpu.memory_space<vmem>>, vector<1x128xf32>
    %4 = vector.broadcast %3 : vector<1x128xf32> to vector<512x128xf32>
    %5 = arith.addf %2, %4 : vector<512x128xf32>
    %c0_5 = arith.constant 0 : index
    %c0_6 = arith.constant 0 : index
    %6 = vector.load %arg4[%c0_5, %c0_6] : memref<512x128xf32, #tpu.memory_space<vmem>>, vector<512x128xf32>
    tpu.vector_store %arg4[%c0_5, %c0_6], %5 {strides = array<i32>} : memref<512x128xf32, #tpu.memory_space<vmem>>, vector<512x128xf32>,
    return
  }
  func.func @transform_0(%arg0: i32) -> (i32, i32) {
    %c0_i32 = arith.constant 0 : i32
    %c0_i32_0 = arith.constant 0 : i32
    return %arg0, %c0_i32 : i32, i32
  }
  func.func @transform_1(%arg0: i32) -> (i32, i32) {
    %c0_i32 = arith.constant 0 : i32
    %c0_i32_0 = arith.constant 0 : i32
    %c0_i32_1 = arith.constant 0 : i32
    return %c0_i32, %c0_i32_0 : i32, i32
  }
  func.func @transform_2(%arg0: i32) -> (i32, i32) {
    %c0_i32 = arith.constant 0 : i32
    %c0_i32_0 = arith.constant 0 : i32
    %c0_i32_1 = arith.constant 0 : i32
    return %c0_i32, %c0_i32_0 : i32, i32
  }
  func.func @transform_3(%arg0: i32) -> (i32, i32) {
    %c0_i32 = arith.constant 0 : i32
    %c0_i32_0 = arith.constant 0 : i32
    return %arg0, %c0_i32 : i32, i32
  }
}

</mosaic_0001>

<bundles_post_ra>
// kernel: convbn_fix_forward.3
= control target key start
LH: loop header
LB: loop body
LE: loop exit
PB: predicated region body
PF: predicated region fallthrough
CT: control target
= control target key end

     0   :  { %s1332_s1 = inlined_call_operand.vmem [shape: f32[128,128], index: 1, kind: input, shape index: {}]   ;;  %s1333_s0 = inlined_call_operand.vmem [shape: f32[512,128], index: 0, kind: input, shape index: {}]   ;;  %s1334_s2 = inlined_call_operand.vmem [shape: f32[1,128], index: 2, kind: input, shape index: {}]   ;;  %s1335_s3 = inlined_call_operand.vmem [shape: f32[512,128], index: 3, kind: output, shape index: {}]  }
   0x1   :  { %v78_v0 = vld [vmem:[%s1332_s1] sm:$0xff]  ;;  %v79_v1 = vld [vmem:[%s1332_s1 + $0x8] sm:$0xff]  ;;  %v80_v2 = vld [vmem:[%s1332_s1 + $0x10] sm:$0xff] }
   0x2   :  { %v763_v3 = vpack.c.bf16 %v79_v1, %v78_v0  ;;  %v81_v4 = vld [vmem:[%s1332_s1 + $0x18] sm:$0xff]  ;;  %v82_v6 = vld [vmem:[%s1332_s1 + $0x20] sm:$0xff]  ;;  %v83_v7 = vld [vmem:[%s1332_s1 + $0x28] sm:$0xff] }
   0x3   :  { %v767_v5 = vpack.c.bf16 %v81_v4, %v80_v2  ;;  %v771_v8 = vpack.c.bf16 %v83_v7, %v82_v6  ;;  %v14_v9 = vld [vmem:[%s1333_s0] sm:$0xff]  ;;  %v84_v11 = vld [vmem:[%s1332_s1 + $0x30] sm:$0xff]  ;;  %v85_v12 = vld [vmem:[%s1332_s1 + $0x38] sm:$0xff] }
   0x4   :  { %764 = vmatprep.subr.bf16.mxu0 %v763_v3  ;;  %795 = vmatprep.subr.bf16.mxu1 %v763_v3  ;;  %v46_v10 = vld [vmem:[%s1333_s0 + $0x100] sm:$0xff]  ;;  %v775_v13 = vpack.c.bf16 %v85_v12, %v84_v11  ;;  %v87_v15 = vld [vmem:[%s1332_s1 + $0x48] sm:$0xff]  ;;  %v88_v17 = vld [vmem:[%s1332_s1 + $0x50] sm:$0xff] }
   0x5   :  { %766 = vmatpush3.bf16.msra.mxu0 %v763_v3  ;;  %803 = vmatpush3.bf16.msra.mxu1 %v763_v3  ;;  %v86_v14 = vld [vmem:[%s1332_s1 + $0x40] sm:$0xff]  ;;  %v89_v18 = vld [vmem:[%s1332_s1 + $0x58] sm:$0xff]  ;;  %v91_v21 = vld [vmem:[%s1332_s1 + $0x68] sm:$0xff] }
   0x6   :  { %768 = vmatprep.subr.bf16.mxu0 %v767_v5  ;;  %796 = vmatprep.subr.bf16.mxu1 %v767_v5  ;;  %v779_v16 = vpack.c.bf16 %v87_v15, %v86_v14  ;;  %v783_v19 = vpack.c.bf16 %v89_v18, %v88_v17  ;;  %v90_v20 = vld [vmem:[%s1332_s1 + $0x60] sm:$0xff]  ;;  %v92_v23 = vld [vmem:[%s1332_s1 + $0x70] sm:$0xff]  ;;  %v93_v24 = vld [vmem:[%s1332_s1 + $0x78] sm:$0xff] }
   0x7   :  { %667 = vmatprep.mubr.f32.mxu0 %v14_v9  ;;  %715 = vmatprep.mubr.f32.mxu1 %v46_v10  ;;  %v787_v22 = vpack.c.bf16 %v91_v21, %v90_v20  ;;  %v791_v25 = vpack.c.bf16 %v93_v24, %v92_v23  ;;  %v15_v26 = vld [vmem:[%s1333_s0 + $0x8] sm:$0xff]  ;;  %v16_v28 = vld [vmem:[%s1333_s0 + $0x10] sm:$0xff]  ;;  %v17_v30 = vld [vmem:[%s1333_s0 + $0x18] sm:$0xff] }
   0x8   :  { %v47_v27 = vld [vmem:[%s1333_s0 + $0x108] sm:$0xff]  ;;  %v48_v29 = vld [vmem:[%s1333_s0 + $0x110] sm:$0xff]  ;;  %v49_v31 = vld [vmem:[%s1333_s0 + $0x118] sm:$0xff] }
   0x9   :  { %770 = vmatpush3.bf16.msra.mxu0 %v767_v5  ;;  %804 = vmatpush3.bf16.msra.mxu1 %v767_v5  ;;  %v18_v32 = vld [vmem:[%s1333_s0 + $0x20] sm:$0xff]  ;;  %v19_v34 = vld [vmem:[%s1333_s0 + $0x28] sm:$0xff]  ;;  %v20_v36 = vld [vmem:[%s1333_s0 + $0x30] sm:$0xff] }
   0xa   :  { %772 = vmatprep.subr.bf16.mxu0 %v771_v8  ;;  %797 = vmatprep.subr.bf16.mxu1 %v771_v8  ;;  %v50_v33 = vld [vmem:[%s1333_s0 + $0x120] sm:$0xff]  ;;  %v51_v35 = vld [vmem:[%s1333_s0 + $0x128] sm:$0xff]  ;;  %v52_v37 = vld [vmem:[%s1333_s0 + $0x130] sm:$0xff] }
   0xb   :  { %v21_v38 = vld [vmem:[%s1333_s0 + $0x38] sm:$0xff]  ;;  %v22_v40 = vld [vmem:[%s1333_s0 + $0x40] sm:$0xff]  ;;  %v23_v42 = vld [vmem:[%s1333_s0 + $0x48] sm:$0xff] }
   0xc   :  { %v53_v39 = vld [vmem:[%s1333_s0 + $0x138] sm:$0xff]  ;;  %v54_v41 = vld [vmem:[%s1333_s0 + $0x140] sm:$0xff]  ;;  %v55_v43 = vld [vmem:[%s1333_s0 + $0x148] sm:$0xff] }
   0xd   :  { %774 = vmatpush3.bf16.msra.mxu0 %v771_v8  ;;  %805 = vmatpush3.bf16.msra.mxu1 %v771_v8  ;;  %v24_v44 = vld [vmem:[%s1333_s0 + $0x50] sm:$0xff]  ;;  %v25_v46 = vld [vmem:[%s1333_s0 + $0x58] sm:$0xff]  ;;  %v26_v48 = vld [vmem:[%s1333_s0 + $0x60] sm:$0xff] }
   0xe   :  { %776 = vmatprep.subr.bf16.mxu0 %v775_v13  ;;  %798 = vmatprep.subr.bf16.mxu1 %v775_v13  ;;  %v56_v45 = vld [vmem:[%s1333_s0 + $0x150] sm:$0xff]  ;;  %v57_v47 = vld [vmem:[%s1333_s0 + $0x158] sm:$0xff]  ;;  %v58_v49 = vld [vmem:[%s1333_s0 + $0x160] sm:$0xff] }
   0xf   :  { %v27_v50 = vld [vmem:[%s1333_s0 + $0x68] sm:$0xff]  ;;  %v28_v52 = vld [vmem:[%s1333_s0 + $0x70] sm:$0xff]  ;;  %v29_v54 = vld [vmem:[%s1333_s0 + $0x78] sm:$0xff] }
  0x10   :  { %v59_v51 = vld [vmem:[%s1333_s0 + $0x168] sm:$0xff]  ;;  %v60_v53 = vld [vmem:[%s1333_s0 + $0x170] sm:$0xff]  ;;  %v61_v55 = vld [vmem:[%s1333_s0 + $0x178] sm:$0xff] }
  0x11   :  { %778 = vmatpush3.bf16.msra.mxu0 %v775_v13  ;;  %806 = vmatpush3.bf16.msra.mxu1 %v775_v13  ;;  %v30_v56 = vld [vmem:[%s1333_s0 + $0x80] sm:$0xff]  ;;  %v31_v58 = vld [vmem:[%s1333_s0 + $0x88] sm:$0xff]  ;;  %v32_v60 = vld [vmem:[%s1333_s0 + $0x90] sm:$0xff] }
  0x12   :  { %780 = vmatprep.subr.bf16.mxu0 %v779_v16  ;;  %799 = vmatprep.subr.bf16.mxu1 %v779_v16  ;;  %v62_v57 = vld [vmem:[%s1333_s0 + $0x180] sm:$0xff]  ;;  %v63_v59 = vld [vmem:[%s1333_s0 + $0x188] sm:$0xff]  ;;  %v64_v61 = vld [vmem:[%s1333_s0 + $0x190] sm:$0xff] }
  0x13   :  { %v33_v62 = vld [vmem:[%s1333_s0 + $0x98] sm:$0xff]  ;;  %v34_v0 = vld [vmem:[%s1333_s0 + $0xa0] sm:$0xff]  ;;  %v35_v2 = vld [vmem:[%s1333_s0 + $0xa8] sm:$0xff] }
  0x14   :  { %v65_v63 = vld [vmem:[%s1333_s0 + $0x198] sm:$0xff]  ;;  %v66_v1 = vld [vmem:[%s1333_s0 + $0x1a0] sm:$0xff]  ;;  %v67_v3 = vld [vmem:[%s1333_s0 + $0x1a8] sm:$0xff] }
  0x15   :  { %782 = vmatpush3.bf16.msra.mxu0 %v779_v16  ;;  %807 = vmatpush3.bf16.msra.mxu1 %v779_v16  ;;  %v36_v4 = vld [vmem:[%s1333_s0 + $0xb0] sm:$0xff]  ;;  %v37_v6 = vld [vmem:[%s1333_s0 + $0xb8] sm:$0xff]  ;;  %v38_v8 = vld [vmem:[%s1333_s0 + $0xc0] sm:$0xff] }
  0x16   :  { %784 = vmatprep.subr.bf16.mxu0 %v783_v19  ;;  %800 = vmatprep.subr.bf16.mxu1 %v783_v19  ;;  %v68_v5 = vld [vmem:[%s1333_s0 + $0x1b0] sm:$0xff]  ;;  %v69_v7 = vld [vmem:[%s1333_s0 + $0x1b8] sm:$0xff]  ;;  %v70_v9 = vld [vmem:[%s1333_s0 + $0x1c0] sm:$0xff] }
  0x17   :  { %v39_v10 = vld [vmem:[%s1333_s0 + $0xc8] sm:$0xff]  ;;  %v40_v12 = vld [vmem:[%s1333_s0 + $0xd0] sm:$0xff]  ;;  %v41_v14 = vld [vmem:[%s1333_s0 + $0xd8] sm:$0xff] }
  0x18   :  { %v71_v11 = vld [vmem:[%s1333_s0 + $0x1c8] sm:$0xff]  ;;  %v72_v13 = vld [vmem:[%s1333_s0 + $0x1d0] sm:$0xff]  ;;  %v73_v15 = vld [vmem:[%s1333_s0 + $0x1d8] sm:$0xff] }
  0x19   :  { %786 = vmatpush3.bf16.msra.mxu0 %v783_v19  ;;  %808 = vmatpush3.bf16.msra.mxu1 %v783_v19  ;;  %v42_v16 = vld [vmem:[%s1333_s0 + $0xe0] sm:$0xff]  ;;  %v43_v18 = vld [vmem:[%s1333_s0 + $0xe8] sm:$0xff]  ;;  %v44_v20 = vld [vmem:[%s1333_s0 + $0xf0] sm:$0xff] }
  0x1a   :  { %788 = vmatprep.subr.bf16.mxu0 %v787_v22  ;;  %801 = vmatprep.subr.bf16.mxu1 %v787_v22  ;;  %v74_v17 = vld [vmem:[%s1333_s0 + $0x1e0] sm:$0xff]  ;;  %v75_v19 = vld [vmem:[%s1333_s0 + $0x1e8] sm:$0xff]  ;;  %v76_v21 = vld [vmem:[%s1333_s0 + $0x1f0] sm:$0xff] }
  0x1b   :  { %v77_v23 = vld [vmem:[%s1333_s0 + $0x1f8] sm:$0xff]  ;;  %v1074_v24 = vld [vmem:[%s1334_s2] ss:$0 sm:$0xff] }
  0x1d   :  { %790 = vmatpush3.bf16.msra.mxu0 %v787_v22  ;;  %809 = vmatpush3.bf16.msra.mxu1 %v787_v22  ;;  %v45_v22 = vld [vmem:[%s1333_s0 + $0xf8] sm:$0xff] }
  0x1e   :  { %792 = vmatprep.subr.bf16.mxu0 %v791_v25  ;;  %802 = vmatprep.subr.bf16.mxu1 %v791_v25 }
  0x21   :  { %794 = vmatpush3.bf16.msra.mxu0 %v791_v25  ;;  %810 = vmatpush3.bf16.msra.mxu1 %v791_v25 }
  0x24   :  { %668 = vmatmul.mubr.f32.vlgmr.msra.gmra.mrb[0].mxu0 %v15_v26  ;;  %716 = vmatmul.mubr.f32.vlgmr.msra.gmra.mrb[0].mxu1 %v47_v27 }
  0x25   :  { %670 = vmatprep.mubr.f32.mxu0 %v16_v28  ;;  %718 = vmatprep.mubr.f32.mxu1 %v48_v29 }
  0x28   :  { %671 = vmatmul.mubr.f32.gmra.mrb[2].mxu0 %v17_v30  ;;  %719 = vmatmul.mubr.f32.gmra.mrb[2].mxu1 %v49_v31 }
  0x29   :  { %673 = vmatprep.mubr.f32.mxu0 %v18_v32  ;;  %721 = vmatprep.mubr.f32.mxu1 %v50_v33 }
  0x2c   :  { %674 = vmatmul.mubr.f32.gmra.mrb[4].mxu0 %v19_v34  ;;  %722 = vmatmul.mubr.f32.gmra.mrb[4].mxu1 %v51_v35 }
  0x2d   :  { %676 = vmatprep.mubr.f32.mxu0 %v20_v36  ;;  %724 = vmatprep.mubr.f32.mxu1 %v52_v37 }
  0x30   :  { %677 = vmatmul.mubr.f32.gmra.mrb[6].mxu0 %v21_v38  ;;  %725 = vmatmul.mubr.f32.gmra.mrb[6].mxu1 %v53_v39 }
  0x31   :  { %679 = vmatprep.mubr.f32.mxu0 %v22_v40  ;;  %727 = vmatprep.mubr.f32.mxu1 %v54_v41 }
  0x34   :  { %680 = vmatmul.mubr.f32.gmra.mrb[8].mxu0 %v23_v42  ;;  %728 = vmatmul.mubr.f32.gmra.mrb[8].mxu1 %v55_v43 }
  0x35   :  { %682 = vmatprep.mubr.f32.mxu0 %v24_v44  ;;  %730 = vmatprep.mubr.f32.mxu1 %v56_v45 }
  0x38   :  { %683 = vmatmul.mubr.f32.gmra.mrb[10].mxu0 %v25_v46  ;;  %731 = vmatmul.mubr.f32.gmra.mrb[10].mxu1 %v57_v47 }
  0x39   :  { %685 = vmatprep.mubr.f32.mxu0 %v26_v48  ;;  %733 = vmatprep.mubr.f32.mxu1 %v58_v49 }
  0x3c   :  { %686 = vmatmul.mubr.f32.gmra.mrb[12].mxu0 %v27_v50  ;;  %734 = vmatmul.mubr.f32.gmra.mrb[12].mxu1 %v59_v51 }
  0x3d   :  { %688 = vmatprep.mubr.f32.mxu0 %v28_v52  ;;  %736 = vmatprep.mubr.f32.mxu1 %v60_v53 }
  0x40   :  { %689 = vmatmul.mubr.f32.gmra.mrb[14].mxu0 %v29_v54  ;;  %737 = vmatmul.mubr.f32.gmra.mrb[14].mxu1 %v61_v55 }
  0x41   :  { %691 = vmatprep.mubr.f32.mxu0 %v30_v56  ;;  %739 = vmatprep.mubr.f32.mxu1 %v62_v57 }
  0x44   :  { %692 = vmatmul.mubr.f32.gmra.mrb[16].mxu0 %v31_v58  ;;  %740 = vmatmul.mubr.f32.gmra.mrb[16].mxu1 %v63_v59 }
  0x45   :  { %694 = vmatprep.mubr.f32.mxu0 %v32_v60  ;;  %742 = vmatprep.mubr.f32.mxu1 %v64_v61 }
  0x48   :  { %695 = vmatmul.mubr.f32.gmra.mrb[18].mxu0 %v33_v62  ;;  %743 = vmatmul.mubr.f32.gmra.mrb[18].mxu1 %v65_v63 }
  0x49   :  { %697 = vmatprep.mubr.f32.mxu0 %v34_v0  ;;  %745 = vmatprep.mubr.f32.mxu1 %v66_v1 }
  0x4c   :  { %698 = vmatmul.mubr.f32.gmra.mrb[20].mxu0 %v35_v2  ;;  %746 = vmatmul.mubr.f32.gmra.mrb[20].mxu1 %v67_v3 }
  0x4d   :  { %700 = vmatprep.mubr.f32.mxu0 %v36_v4  ;;  %748 = vmatprep.mubr.f32.mxu1 %v68_v5 }
  0x50   :  { %701 = vmatmul.mubr.f32.gmra.mrb[22].mxu0 %v37_v6  ;;  %749 = vmatmul.mubr.f32.gmra.mrb[22].mxu1 %v69_v7 }
  0x51   :  { %703 = vmatprep.mubr.f32.mxu0 %v38_v8  ;;  %751 = vmatprep.mubr.f32.mxu1 %v70_v9 }
  0x54   :  { %704 = vmatmul.mubr.f32.gmra.mrb[24].mxu0 %v39_v10  ;;  %752 = vmatmul.mubr.f32.gmra.mrb[24].mxu1 %v71_v11 }
  0x55   :  { %706 = vmatprep.mubr.f32.mxu0 %v40_v12  ;;  %754 = vmatprep.mubr.f32.mxu1 %v72_v13 }
  0x58   :  { %707 = vmatmul.mubr.f32.gmra.mrb[26].mxu0 %v41_v14  ;;  %755 = vmatmul.mubr.f32.gmra.mrb[26].mxu1 %v73_v15 }
  0x59   :  { %709 = vmatprep.mubr.f32.mxu0 %v42_v16  ;;  %757 = vmatprep.mubr.f32.mxu1 %v74_v17 }
  0x5c   :  { %710 = vmatmul.mubr.f32.gmra.mrb[28].mxu0 %v43_v18  ;;  %758 = vmatmul.mubr.f32.gmra.mrb[28].mxu1 %v75_v19 }
  0x5d   :  { %712 = vmatprep.mubr.f32.mxu0 %v44_v20  ;;  %760 = vmatprep.mubr.f32.mxu1 %v76_v21 }
  0x60   :  { %713 = vmatmul.mubr.f32.gmra.mrb[30].mxu0 %v45_v22  ;;  %761 = vmatmul.mubr.f32.gmra.mrb[30].mxu1 %v77_v23 }
  0xf7   :  { %v669_v25 = vpop.f32.mrb[0].mxu0  ;;  %v717_v26 = vpop.f32.mrb[0].mxu1 }
  0xf8   :  { %v173_v27 = vadd.f32 %v669_v25, %v1074_v24  ;;  %v333_v28 = vadd.f32 %v717_v26, %v1074_v24  ;;  %v167_v29 = vpop.f32.mrb[1].mxu0  ;;  %v327_v30 = vpop.f32.mrb[1].mxu1 }
  0xf9   :  { %v168_v31 = vadd.f32 %v1074_v24, %v167_v29  ;;  %v328_v32 = vadd.f32 %v1074_v24, %v327_v30 }
  0xfa   :  { %487 = vst [vmem:[%s1335_s3 + $0x8] sm:$0xff] %v173_v27  ;;  %519 = vst [vmem:[%s1335_s3 + $0x108] sm:$0xff] %v333_v28 }
  0xfb   :  { %486 = vst [vmem:[%s1335_s3] sm:$0xff] %v168_v31  ;;  %518 = vst [vmem:[%s1335_s3 + $0x100] sm:$0xff] %v328_v32  ;;  %v672_v33 = vpop.f32.mrb[2].mxu0  ;;  %v720_v34 = vpop.f32.mrb[2].mxu1 }
  0xfc   :  { %v183_v35 = vadd.f32 %v672_v33, %v1074_v24  ;;  %v343_v36 = vadd.f32 %v720_v34, %v1074_v24  ;;  %v177_v37 = vpop.f32.mrb[3].mxu0  ;;  %v337_v38 = vpop.f32.mrb[3].mxu1 }
  0xfd   :  { %v178_v39 = vadd.f32 %v1074_v24, %v177_v37  ;;  %v338_v40 = vadd.f32 %v1074_v24, %v337_v38 }
  0xfe   :  { %489 = vst [vmem:[%s1335_s3 + $0x18] sm:$0xff] %v183_v35  ;;  %521 = vst [vmem:[%s1335_s3 + $0x118] sm:$0xff] %v343_v36 }
  0xff   :  { %488 = vst [vmem:[%s1335_s3 + $0x10] sm:$0xff] %v178_v39  ;;  %520 = vst [vmem:[%s1335_s3 + $0x110] sm:$0xff] %v338_v40  ;;  %v675_v41 = vpop.f32.mrb[4].mxu0  ;;  %v723_v42 = vpop.f32.mrb[4].mxu1 }
 0x100   :  { %v193_v43 = vadd.f32 %v675_v41, %v1074_v24  ;;  %v353_v44 = vadd.f32 %v723_v42, %v1074_v24  ;;  %v187_v45 = vpop.f32.mrb[5].mxu0  ;;  %v347_v46 = vpop.f32.mrb[5].mxu1 }
 0x101   :  { %v188_v47 = vadd.f32 %v1074_v24, %v187_v45  ;;  %v348_v48 = vadd.f32 %v1074_v24, %v347_v46 }
 0x102   :  { %491 = vst [vmem:[%s1335_s3 + $0x28] sm:$0xff] %v193_v43  ;;  %523 = vst [vmem:[%s1335_s3 + $0x128] sm:$0xff] %v353_v44 }
 0x103   :  { %490 = vst [vmem:[%s1335_s3 + $0x20] sm:$0xff] %v188_v47  ;;  %522 = vst [vmem:[%s1335_s3 + $0x120] sm:$0xff] %v348_v48  ;;  %v678_v49 = vpop.f32.mrb[6].mxu0  ;;  %v726_v50 = vpop.f32.mrb[6].mxu1 }
 0x104   :  { %v203_v51 = vadd.f32 %v678_v49, %v1074_v24  ;;  %v363_v52 = vadd.f32 %v726_v50, %v1074_v24  ;;  %v197_v53 = vpop.f32.mrb[7].mxu0  ;;  %v357_v54 = vpop.f32.mrb[7].mxu1 }
 0x105   :  { %v198_v55 = vadd.f32 %v1074_v24, %v197_v53  ;;  %v358_v56 = vadd.f32 %v1074_v24, %v357_v54 }
 0x106   :  { %493 = vst [vmem:[%s1335_s3 + $0x38] sm:$0xff] %v203_v51  ;;  %525 = vst [vmem:[%s1335_s3 + $0x138] sm:$0xff] %v363_v52 }
 0x107   :  { %492 = vst [vmem:[%s1335_s3 + $0x30] sm:$0xff] %v198_v55  ;;  %524 = vst [vmem:[%s1335_s3 + $0x130] sm:$0xff] %v358_v56  ;;  %v681_v57 = vpop.f32.mrb[8].mxu0  ;;  %v729_v58 = vpop.f32.mrb[8].mxu1 }
 0x108   :  { %v213_v59 = vadd.f32 %v681_v57, %v1074_v24  ;;  %v373_v60 = vadd.f32 %v729_v58, %v1074_v24  ;;  %v207_v61 = vpop.f32.mrb[9].mxu0  ;;  %v367_v62 = vpop.f32.mrb[9].mxu1 }
 0x109   :  { %v208_v63 = vadd.f32 %v1074_v24, %v207_v61  ;;  %v368_v0 = vadd.f32 %v1074_v24, %v367_v62 }
 0x10a   :  { %495 = vst [vmem:[%s1335_s3 + $0x48] sm:$0xff] %v213_v59  ;;  %527 = vst [vmem:[%s1335_s3 + $0x148] sm:$0xff] %v373_v60 }
 0x10b   :  { %494 = vst [vmem:[%s1335_s3 + $0x40] sm:$0xff] %v208_v63  ;;  %526 = vst [vmem:[%s1335_s3 + $0x140] sm:$0xff] %v368_v0  ;;  %v684_v1 = vpop.f32.mrb[10].mxu0  ;;  %v732_v2 = vpop.f32.mrb[10].mxu1 }
 0x10c   :  { %v223_v3 = vadd.f32 %v684_v1, %v1074_v24  ;;  %v383_v4 = vadd.f32 %v732_v2, %v1074_v24  ;;  %v217_v5 = vpop.f32.mrb[11].mxu0  ;;  %v377_v6 = vpop.f32.mrb[11].mxu1 }
 0x10d   :  { %v218_v7 = vadd.f32 %v1074_v24, %v217_v5  ;;  %v378_v8 = vadd.f32 %v1074_v24, %v377_v6 }
 0x10e   :  { %497 = vst [vmem:[%s1335_s3 + $0x58] sm:$0xff] %v223_v3  ;;  %529 = vst [vmem:[%s1335_s3 + $0x158] sm:$0xff] %v383_v4 }
 0x10f   :  { %496 = vst [vmem:[%s1335_s3 + $0x50] sm:$0xff] %v218_v7  ;;  %528 = vst [vmem:[%s1335_s3 + $0x150] sm:$0xff] %v378_v8  ;;  %v687_v9 = vpop.f32.mrb[12].mxu0  ;;  %v735_v10 = vpop.f32.mrb[12].mxu1 }
 0x110   :  { %v233_v11 = vadd.f32 %v687_v9, %v1074_v24  ;;  %v393_v12 = vadd.f32 %v735_v10, %v1074_v24  ;;  %v227_v13 = vpop.f32.mrb[13].mxu0  ;;  %v387_v14 = vpop.f32.mrb[13].mxu1 }
 0x111   :  { %v228_v15 = vadd.f32 %v1074_v24, %v227_v13  ;;  %v388_v16 = vadd.f32 %v1074_v24, %v387_v14 }
 0x112   :  { %499 = vst [vmem:[%s1335_s3 + $0x68] sm:$0xff] %v233_v11  ;;  %531 = vst [vmem:[%s1335_s3 + $0x168] sm:$0xff] %v393_v12 }
 0x113   :  { %498 = vst [vmem:[%s1335_s3 + $0x60] sm:$0xff] %v228_v15  ;;  %530 = vst [vmem:[%s1335_s3 + $0x160] sm:$0xff] %v388_v16  ;;  %v690_v17 = vpop.f32.mrb[14].mxu0  ;;  %v738_v18 = vpop.f32.mrb[14].mxu1 }
 0x114   :  { %v243_v19 = vadd.f32 %v690_v17, %v1074_v24  ;;  %v403_v20 = vadd.f32 %v738_v18, %v1074_v24  ;;  %v237_v21 = vpop.f32.mrb[15].mxu0  ;;  %v397_v22 = vpop.f32.mrb[15].mxu1 }
 0x115   :  { %v238_v23 = vadd.f32 %v1074_v24, %v237_v21  ;;  %v398_v25 = vadd.f32 %v1074_v24, %v397_v22 }
 0x116   :  { %501 = vst [vmem:[%s1335_s3 + $0x78] sm:$0xff] %v243_v19  ;;  %533 = vst [vmem:[%s1335_s3 + $0x178] sm:$0xff] %v403_v20 }
 0x117   :  { %500 = vst [vmem:[%s1335_s3 + $0x70] sm:$0xff] %v238_v23  ;;  %532 = vst [vmem:[%s1335_s3 + $0x170] sm:$0xff] %v398_v25  ;;  %v693_v26 = vpop.f32.mrb[16].mxu0  ;;  %v741_v27 = vpop.f32.mrb[16].mxu1 }
 0x118   :  { %v253_v28 = vadd.f32 %v693_v26, %v1074_v24  ;;  %v413_v29 = vadd.f32 %v741_v27, %v1074_v24  ;;  %v247_v30 = vpop.f32.mrb[17].mxu0  ;;  %v407_v31 = vpop.f32.mrb[17].mxu1 }
 0x119   :  { %v248_v32 = vadd.f32 %v1074_v24, %v247_v30  ;;  %v408_v33 = vadd.f32 %v1074_v24, %v407_v31 }
 0x11a   :  { %503 = vst [vmem:[%s1335_s3 + $0x88] sm:$0xff] %v253_v28  ;;  %535 = vst [vmem:[%s1335_s3 + $0x188] sm:$0xff] %v413_v29 }
 0x11b   :  { %502 = vst [vmem:[%s1335_s3 + $0x80] sm:$0xff] %v248_v32  ;;  %534 = vst [vmem:[%s1335_s3 + $0x180] sm:$0xff] %v408_v33  ;;  %v696_v34 = vpop.f32.mrb[18].mxu0  ;;  %v744_v35 = vpop.f32.mrb[18].mxu1 }
 0x11c   :  { %v263_v36 = vadd.f32 %v696_v34, %v1074_v24  ;;  %v423_v37 = vadd.f32 %v744_v35, %v1074_v24  ;;  %v257_v38 = vpop.f32.mrb[19].mxu0  ;;  %v417_v39 = vpop.f32.mrb[19].mxu1 }
 0x11d   :  { %v258_v40 = vadd.f32 %v1074_v24, %v257_v38  ;;  %v418_v41 = vadd.f32 %v1074_v24, %v417_v39 }
 0x11e   :  { %505 = vst [vmem:[%s1335_s3 + $0x98] sm:$0xff] %v263_v36  ;;  %537 = vst [vmem:[%s1335_s3 + $0x198] sm:$0xff] %v423_v37 }
 0x11f   :  { %504 = vst [vmem:[%s1335_s3 + $0x90] sm:$0xff] %v258_v40  ;;  %536 = vst [vmem:[%s1335_s3 + $0x190] sm:$0xff] %v418_v41  ;;  %v699_v42 = vpop.f32.mrb[20].mxu0  ;;  %v747_v43 = vpop.f32.mrb[20].mxu1 }
 0x120   :  { %v273_v44 = vadd.f32 %v699_v42, %v1074_v24  ;;  %v433_v45 = vadd.f32 %v747_v43, %v1074_v24  ;;  %v267_v46 = vpop.f32.mrb[21].mxu0  ;;  %v427_v47 = vpop.f32.mrb[21].mxu1 }
 0x121   :  { %v268_v48 = vadd.f32 %v1074_v24, %v267_v46  ;;  %v428_v49 = vadd.f32 %v1074_v24, %v427_v47 }
 0x122   :  { %507 = vst [vmem:[%s1335_s3 + $0xa8] sm:$0xff] %v273_v44  ;;  %539 = vst [vmem:[%s1335_s3 + $0x1a8] sm:$0xff] %v433_v45 }
 0x123   :  { %506 = vst [vmem:[%s1335_s3 + $0xa0] sm:$0xff] %v268_v48  ;;  %538 = vst [vmem:[%s1335_s3 + $0x1a0] sm:$0xff] %v428_v49  ;;  %v702_v50 = vpop.f32.mrb[22].mxu0  ;;  %v750_v51 = vpop.f32.mrb[22].mxu1 }
 0x124   :  { %v283_v52 = vadd.f32 %v702_v50, %v1074_v24  ;;  %v443_v53 = vadd.f32 %v750_v51, %v1074_v24  ;;  %v277_v54 = vpop.f32.mrb[23].mxu0  ;;  %v437_v55 = vpop.f32.mrb[23].mxu1 }
 0x125   :  { %v278_v56 = vadd.f32 %v1074_v24, %v277_v54  ;;  %v438_v57 = vadd.f32 %v1074_v24, %v437_v55 }
 0x126   :  { %509 = vst [vmem:[%s1335_s3 + $0xb8] sm:$0xff] %v283_v52  ;;  %541 = vst [vmem:[%s1335_s3 + $0x1b8] sm:$0xff] %v443_v53 }
 0x127   :  { %508 = vst [vmem:[%s1335_s3 + $0xb0] sm:$0xff] %v278_v56  ;;  %540 = vst [vmem:[%s1335_s3 + $0x1b0] sm:$0xff] %v438_v57  ;;  %v705_v58 = vpop.f32.mrb[24].mxu0  ;;  %v753_v59 = vpop.f32.mrb[24].mxu1 }
 0x128   :  { %v293_v60 = vadd.f32 %v705_v58, %v1074_v24  ;;  %v453_v61 = vadd.f32 %v753_v59, %v1074_v24  ;;  %v287_v62 = vpop.f32.mrb[25].mxu0  ;;  %v447_v63 = vpop.f32.mrb[25].mxu1 }
 0x129   :  { %v288_v0 = vadd.f32 %v1074_v24, %v287_v62  ;;  %v448_v1 = vadd.f32 %v1074_v24, %v447_v63 }
 0x12a   :  { %511 = vst [vmem:[%s1335_s3 + $0xc8] sm:$0xff] %v293_v60  ;;  %543 = vst [vmem:[%s1335_s3 + $0x1c8] sm:$0xff] %v453_v61 }
 0x12b   :  { %510 = vst [vmem:[%s1335_s3 + $0xc0] sm:$0xff] %v288_v0  ;;  %542 = vst [vmem:[%s1335_s3 + $0x1c0] sm:$0xff] %v448_v1  ;;  %v708_v2 = vpop.f32.mrb[26].mxu0  ;;  %v756_v3 = vpop.f32.mrb[26].mxu1 }
 0x12c   :  { %v303_v4 = vadd.f32 %v708_v2, %v1074_v24  ;;  %v463_v5 = vadd.f32 %v756_v3, %v1074_v24  ;;  %v297_v6 = vpop.f32.mrb[27].mxu0  ;;  %v457_v7 = vpop.f32.mrb[27].mxu1 }
 0x12d   :  { %v298_v8 = vadd.f32 %v1074_v24, %v297_v6  ;;  %v458_v9 = vadd.f32 %v1074_v24, %v457_v7 }
 0x12e   :  { %513 = vst [vmem:[%s1335_s3 + $0xd8] sm:$0xff] %v303_v4  ;;  %545 = vst [vmem:[%s1335_s3 + $0x1d8] sm:$0xff] %v463_v5 }
 0x12f   :  { %512 = vst [vmem:[%s1335_s3 + $0xd0] sm:$0xff] %v298_v8  ;;  %544 = vst [vmem:[%s1335_s3 + $0x1d0] sm:$0xff] %v458_v9  ;;  %v711_v10 = vpop.f32.mrb[28].mxu0  ;;  %v759_v11 = vpop.f32.mrb[28].mxu1 }
 0x130   :  { %v313_v12 = vadd.f32 %v711_v10, %v1074_v24  ;;  %v473_v13 = vadd.f32 %v759_v11, %v1074_v24  ;;  %v307_v14 = vpop.f32.mrb[29].mxu0  ;;  %v467_v15 = vpop.f32.mrb[29].mxu1 }
 0x131   :  { %v308_v16 = vadd.f32 %v1074_v24, %v307_v14  ;;  %v468_v17 = vadd.f32 %v1074_v24, %v467_v15 }
 0x132   :  { %515 = vst [vmem:[%s1335_s3 + $0xe8] sm:$0xff] %v313_v12  ;;  %547 = vst [vmem:[%s1335_s3 + $0x1e8] sm:$0xff] %v473_v13 }
 0x133   :  { %514 = vst [vmem:[%s1335_s3 + $0xe0] sm:$0xff] %v308_v16  ;;  %546 = vst [vmem:[%s1335_s3 + $0x1e0] sm:$0xff] %v468_v17  ;;  %v714_v18 = vpop.f32.mrb[30].mxu0  ;;  %v762_v19 = vpop.f32.mrb[30].mxu1 }
 0x134   :  { %v323_v20 = vadd.f32 %v714_v18, %v1074_v24  ;;  %v483_v21 = vadd.f32 %v762_v19, %v1074_v24  ;;  %v317_v22 = vpop.f32.mrb[31].mxu0  ;;  %v477_v23 = vpop.f32.mrb[31].mxu1 }
 0x135   :  { %v318_v25 = vadd.f32 %v1074_v24, %v317_v22  ;;  %v478_v26 = vadd.f32 %v1074_v24, %v477_v23 }
 0x136   :  { %517 = vst [vmem:[%s1335_s3 + $0xf8] sm:$0xff] %v323_v20  ;;  %549 = vst [vmem:[%s1335_s3 + $0x1f8] sm:$0xff] %v483_v21 }
 0x137   :  { %516 = vst [vmem:[%s1335_s3 + $0xf0] sm:$0xff] %v318_v25  ;;  %548 = vst [vmem:[%s1335_s3 + $0x1f0] sm:$0xff] %v478_v26 }

// kernel: convbn_fix_forward.2
= control target key start
LH: loop header
LB: loop body
LE: loop exit
PB: predicated region body
PF: predicated region fallthrough
CT: control target
= control target key end

     0   :  { %s1872_s1 = inlined_call_operand.vmem [shape: f32[128,128], index: 1, kind: input, shape index: {}]   ;;  %s1873_s0 = inlined_call_operand.vmem [shape: f32[512,128], index: 0, kind: input, shape index: {}]   ;;  %s1874_s3 = inlined_call_operand.vmem [shape: f32[1,128], index: 3, kind: output, shape index: {1}]   ;;  %s1875_s4 = inlined_call_operand.vmem [shape: f32[1,128], index: 4, kind: output, shape index: {2}]   ;;  %s1876_s2 = inlined_call_operand.vmem [shape: f32[1,128], index: 2, kind: output, shape index: {0}]  }
   0x1   :  { %v78_v0 = vld [vmem:[%s1872_s1] sm:$0xff]  ;;  %v79_v1 = vld [vmem:[%s1872_s1 + $0x8] sm:$0xff]  ;;  %v80_v2 = vld [vmem:[%s1872_s1 + $0x10] sm:$0xff] }
   0x2   :  { %v1056_v3 = vpack.c.bf16 %v79_v1, %v78_v0  ;;  %v81_v4 = vld [vmem:[%s1872_s1 + $0x18] sm:$0xff]  ;;  %v82_v6 = vld [vmem:[%s1872_s1 + $0x20] sm:$0xff]  ;;  %v83_v7 = vld [vmem:[%s1872_s1 + $0x28] sm:$0xff] }
   0x3   :  { %v1060_v5 = vpack.c.bf16 %v81_v4, %v80_v2  ;;  %v1064_v8 = vpack.c.bf16 %v83_v7, %v82_v6  ;;  %v14_v9 = vld [vmem:[%s1873_s0] sm:$0xff]  ;;  %v84_v10 = vld [vmem:[%s1872_s1 + $0x30] sm:$0xff]  ;;  %v85_v11 = vld [vmem:[%s1872_s1 + $0x38] sm:$0xff] }
   0x4   :  { %1057 = vmatprep.subr.bf16.mxu0 %v1056_v3  ;;  %1088 = vmatprep.subr.bf16.mxu1 %v1056_v3  ;;  %v1068_v12 = vpack.c.bf16 %v85_v11, %v84_v10  ;;  %v86_v13 = vld [vmem:[%s1872_s1 + $0x40] sm:$0xff]  ;;  %v87_v14 = vld [vmem:[%s1872_s1 + $0x48] sm:$0xff]  ;;  %v88_v16 = vld [vmem:[%s1872_s1 + $0x50] sm:$0xff] }
   0x5   :  { %1059 = vmatpush3.bf16.msra.mxu0 %v1056_v3  ;;  %1096 = vmatpush3.bf16.msra.mxu1 %v1056_v3  ;;  %v1072_v15 = vpack.c.bf16 %v87_v14, %v86_v13  ;;  %v89_v17 = vld [vmem:[%s1872_s1 + $0x58] sm:$0xff]  ;;  %v46_v18 = vld [vmem:[%s1873_s0 + $0x100] sm:$0xff]  ;;  %v91_v21 = vld [vmem:[%s1872_s1 + $0x68] sm:$0xff] }
   0x6   :  { %1061 = vmatprep.subr.bf16.mxu0 %v1060_v5  ;;  %1089 = vmatprep.subr.bf16.mxu1 %v1060_v5  ;;  %v1076_v19 = vpack.c.bf16 %v89_v17, %v88_v16  ;;  %v90_v20 = vld [vmem:[%s1872_s1 + $0x60] sm:$0xff]  ;;  %v92_v23 = vld [vmem:[%s1872_s1 + $0x70] sm:$0xff]  ;;  %v93_v24 = vld [vmem:[%s1872_s1 + $0x78] sm:$0xff] }
   0x7   :  { %960 = vmatprep.mubr.f32.mxu0 %v14_v9  ;;  %1008 = vmatprep.mubr.f32.mxu1 %v46_v18  ;;  %v1080_v22 = vpack.c.bf16 %v91_v21, %v90_v20  ;;  %v1084_v25 = vpack.c.bf16 %v93_v24, %v92_v23  ;;  %v15_v26 = vld [vmem:[%s1873_s0 + $0x8] sm:$0xff]  ;;  %v16_v28 = vld [vmem:[%s1873_s0 + $0x10] sm:$0xff]  ;;  %v17_v30 = vld [vmem:[%s1873_s0 + $0x18] sm:$0xff] }
   0x8   :  { %v47_v27 = vld [vmem:[%s1873_s0 + $0x108] sm:$0xff]  ;;  %v48_v29 = vld [vmem:[%s1873_s0 + $0x110] sm:$0xff]  ;;  %v49_v31 = vld [vmem:[%s1873_s0 + $0x118] sm:$0xff] }
   0x9   :  { %1063 = vmatpush3.bf16.msra.mxu0 %v1060_v5  ;;  %1097 = vmatpush3.bf16.msra.mxu1 %v1060_v5  ;;  %v18_v32 = vld [vmem:[%s1873_s0 + $0x20] sm:$0xff]  ;;  %v19_v34 = vld [vmem:[%s1873_s0 + $0x28] sm:$0xff]  ;;  %v20_v36 = vld [vmem:[%s1873_s0 + $0x30] sm:$0xff] }
   0xa   :  { %1065 = vmatprep.subr.bf16.mxu0 %v1064_v8  ;;  %1090 = vmatprep.subr.bf16.mxu1 %v1064_v8  ;;  %v50_v33 = vld [vmem:[%s1873_s0 + $0x120] sm:$0xff]  ;;  %v51_v35 = vld [vmem:[%s1873_s0 + $0x128] sm:$0xff]  ;;  %v52_v37 = vld [vmem:[%s1873_s0 + $0x130] sm:$0xff] }
   0xb   :  { %v21_v38 = vld [vmem:[%s1873_s0 + $0x38] sm:$0xff]  ;;  %v22_v40 = vld [vmem:[%s1873_s0 + $0x40] sm:$0xff]  ;;  %v23_v42 = vld [vmem:[%s1873_s0 + $0x48] sm:$0xff] }
   0xc   :  { %v53_v39 = vld [vmem:[%s1873_s0 + $0x138] sm:$0xff]  ;;  %v54_v41 = vld [vmem:[%s1873_s0 + $0x140] sm:$0xff]  ;;  %v55_v43 = vld [vmem:[%s1873_s0 + $0x148] sm:$0xff] }
   0xd   :  { %1067 = vmatpush3.bf16.msra.mxu0 %v1064_v8  ;;  %1098 = vmatpush3.bf16.msra.mxu1 %v1064_v8  ;;  %v24_v44 = vld [vmem:[%s1873_s0 + $0x50] sm:$0xff]  ;;  %v25_v46 = vld [vmem:[%s1873_s0 + $0x58] sm:$0xff]  ;;  %v26_v48 = vld [vmem:[%s1873_s0 + $0x60] sm:$0xff] }
   0xe   :  { %1069 = vmatprep.subr.bf16.mxu0 %v1068_v12  ;;  %1091 = vmatprep.subr.bf16.mxu1 %v1068_v12  ;;  %v56_v45 = vld [vmem:[%s1873_s0 + $0x150] sm:$0xff]  ;;  %v57_v47 = vld [vmem:[%s1873_s0 + $0x158] sm:$0xff]  ;;  %v58_v49 = vld [vmem:[%s1873_s0 + $0x160] sm:$0xff] }
   0xf   :  { %v27_v50 = vld [vmem:[%s1873_s0 + $0x68] sm:$0xff]  ;;  %v28_v52 = vld [vmem:[%s1873_s0 + $0x70] sm:$0xff]  ;;  %v29_v54 = vld [vmem:[%s1873_s0 + $0x78] sm:$0xff] }
  0x10   :  { %v59_v51 = vld [vmem:[%s1873_s0 + $0x168] sm:$0xff]  ;;  %v60_v53 = vld [vmem:[%s1873_s0 + $0x170] sm:$0xff]  ;;  %v61_v55 = vld [vmem:[%s1873_s0 + $0x178] sm:$0xff] }
  0x11   :  { %1071 = vmatpush3.bf16.msra.mxu0 %v1068_v12  ;;  %1099 = vmatpush3.bf16.msra.mxu1 %v1068_v12  ;;  %v30_v56 = vld [vmem:[%s1873_s0 + $0x80] sm:$0xff]  ;;  %v31_v58 = vld [vmem:[%s1873_s0 + $0x88] sm:$0xff]  ;;  %v32_v60 = vld [vmem:[%s1873_s0 + $0x90] sm:$0xff] }
  0x12   :  { %1073 = vmatprep.subr.bf16.mxu0 %v1072_v15  ;;  %1092 = vmatprep.subr.bf16.mxu1 %v1072_v15  ;;  %v62_v57 = vld [vmem:[%s1873_s0 + $0x180] sm:$0xff]  ;;  %v63_v59 = vld [vmem:[%s1873_s0 + $0x188] sm:$0xff]  ;;  %v64_v61 = vld [vmem:[%s1873_s0 + $0x190] sm:$0xff] }
  0x13   :  { %v33_v62 = vld [vmem:[%s1873_s0 + $0x98] sm:$0xff]  ;;  %v34_v0 = vld [vmem:[%s1873_s0 + $0xa0] sm:$0xff]  ;;  %v35_v2 = vld [vmem:[%s1873_s0 + $0xa8] sm:$0xff] }
  0x14   :  { %v65_v63 = vld [vmem:[%s1873_s0 + $0x198] sm:$0xff]  ;;  %v66_v1 = vld [vmem:[%s1873_s0 + $0x1a0] sm:$0xff]  ;;  %v67_v3 = vld [vmem:[%s1873_s0 + $0x1a8] sm:$0xff] }
  0x15   :  { %1075 = vmatpush3.bf16.msra.mxu0 %v1072_v15  ;;  %1100 = vmatpush3.bf16.msra.mxu1 %v1072_v15  ;;  %v36_v4 = vld [vmem:[%s1873_s0 + $0xb0] sm:$0xff]  ;;  %v37_v6 = vld [vmem:[%s1873_s0 + $0xb8] sm:$0xff]  ;;  %v38_v8 = vld [vmem:[%s1873_s0 + $0xc0] sm:$0xff] }
  0x16   :  { %1077 = vmatprep.subr.bf16.mxu0 %v1076_v19  ;;  %1093 = vmatprep.subr.bf16.mxu1 %v1076_v19  ;;  %v68_v5 = vld [vmem:[%s1873_s0 + $0x1b0] sm:$0xff]  ;;  %v69_v7 = vld [vmem:[%s1873_s0 + $0x1b8] sm:$0xff]  ;;  %v70_v9 = vld [vmem:[%s1873_s0 + $0x1c0] sm:$0xff] }
  0x17   :  { %v39_v10 = vld [vmem:[%s1873_s0 + $0xc8] sm:$0xff]  ;;  %v40_v12 = vld [vmem:[%s1873_s0 + $0xd0] sm:$0xff]  ;;  %v41_v14 = vld [vmem:[%s1873_s0 + $0xd8] sm:$0xff] }
  0x18   :  { %v71_v11 = vld [vmem:[%s1873_s0 + $0x1c8] sm:$0xff]  ;;  %v72_v13 = vld [vmem:[%s1873_s0 + $0x1d0] sm:$0xff]  ;;  %v73_v15 = vld [vmem:[%s1873_s0 + $0x1d8] sm:$0xff] }
  0x19   :  { %1079 = vmatpush3.bf16.msra.mxu0 %v1076_v19  ;;  %1101 = vmatpush3.bf16.msra.mxu1 %v1076_v19  ;;  %v42_v16 = vld [vmem:[%s1873_s0 + $0xe0] sm:$0xff]  ;;  %v43_v18 = vld [vmem:[%s1873_s0 + $0xe8] sm:$0xff]  ;;  %v44_v20 = vld [vmem:[%s1873_s0 + $0xf0] sm:$0xff] }
  0x1a   :  { %1081 = vmatprep.subr.bf16.mxu0 %v1080_v22  ;;  %1094 = vmatprep.subr.bf16.mxu1 %v1080_v22  ;;  %v74_v17 = vld [vmem:[%s1873_s0 + $0x1e0] sm:$0xff]  ;;  %v75_v19 = vld [vmem:[%s1873_s0 + $0x1e8] sm:$0xff]  ;;  %v76_v21 = vld [vmem:[%s1873_s0 + $0x1f0] sm:$0xff] }
  0x1b   :  { %v77_v23 = vld [vmem:[%s1873_s0 + $0x1f8] sm:$0xff] }
  0x1d   :  { %1083 = vmatpush3.bf16.msra.mxu0 %v1080_v22  ;;  %1102 = vmatpush3.bf16.msra.mxu1 %v1080_v22  ;;  %v45_v22 = vld [vmem:[%s1873_s0 + $0xf8] sm:$0xff] }
  0x1e   :  { %1085 = vmatprep.subr.bf16.mxu0 %v1084_v25  ;;  %1095 = vmatprep.subr.bf16.mxu1 %v1084_v25 }
  0x21   :  { %1087 = vmatpush3.bf16.msra.mxu0 %v1084_v25  ;;  %1103 = vmatpush3.bf16.msra.mxu1 %v1084_v25 }
  0x24   :  { %961 = vmatmul.mubr.f32.vlgmr.msra.gmra.mrb[0].mxu0 %v15_v26  ;;  %1009 = vmatmul.mubr.f32.vlgmr.msra.gmra.mrb[0].mxu1 %v47_v27 }
  0x25   :  { %963 = vmatprep.mubr.f32.mxu0 %v16_v28  ;;  %1011 = vmatprep.mubr.f32.mxu1 %v48_v29 }
  0x28   :  { %964 = vmatmul.mubr.f32.gmra.mrb[2].mxu0 %v17_v30  ;;  %1012 = vmatmul.mubr.f32.gmra.mrb[2].mxu1 %v49_v31 }
  0x29   :  { %966 = vmatprep.mubr.f32.mxu0 %v18_v32  ;;  %1014 = vmatprep.mubr.f32.mxu1 %v50_v33 }
  0x2c   :  { %967 = vmatmul.mubr.f32.gmra.mrb[4].mxu0 %v19_v34  ;;  %1015 = vmatmul.mubr.f32.gmra.mrb[4].mxu1 %v51_v35 }
  0x2d   :  { %969 = vmatprep.mubr.f32.mxu0 %v20_v36  ;;  %1017 = vmatprep.mubr.f32.mxu1 %v52_v37 }
  0x30   :  { %970 = vmatmul.mubr.f32.gmra.mrb[6].mxu0 %v21_v38  ;;  %1018 = vmatmul.mubr.f32.gmra.mrb[6].mxu1 %v53_v39 }
  0x31   :  { %972 = vmatprep.mubr.f32.mxu0 %v22_v40  ;;  %1020 = vmatprep.mubr.f32.mxu1 %v54_v41 }
  0x34   :  { %973 = vmatmul.mubr.f32.gmra.mrb[8].mxu0 %v23_v42  ;;  %1021 = vmatmul.mubr.f32.gmra.mrb[8].mxu1 %v55_v43 }
  0x35   :  { %975 = vmatprep.mubr.f32.mxu0 %v24_v44  ;;  %1023 = vmatprep.mubr.f32.mxu1 %v56_v45 }
  0x38   :  { %976 = vmatmul.mubr.f32.gmra.mrb[10].mxu0 %v25_v46  ;;  %1024 = vmatmul.mubr.f32.gmra.mrb[10].mxu1 %v57_v47 }
  0x39   :  { %978 = vmatprep.mubr.f32.mxu0 %v26_v48  ;;  %1026 = vmatprep.mubr.f32.mxu1 %v58_v49 }
  0x3c   :  { %979 = vmatmul.mubr.f32.gmra.mrb[12].mxu0 %v27_v50  ;;  %1027 = vmatmul.mubr.f32.gmra.mrb[12].mxu1 %v59_v51  ;;  %v1105_v51 = vmov 0.0  }
  0x3d   :  { %981 = vmatprep.mubr.f32.mxu0 %v28_v52  ;;  %1029 = vmatprep.mubr.f32.mxu1 %v60_v53  ;;  %554 = vst [vmem:[%s1874_s3] sm:$0x1] %v1105_v51  ;;  %555 = vst [vmem:[%s1875_s4] sm:$0x1] %v1105_v51 }
  0x40   :  { %982 = vmatmul.mubr.f32.gmra.mrb[14].mxu0 %v29_v54  ;;  %1030 = vmatmul.mubr.f32.gmra.mrb[14].mxu1 %v61_v55 }
  0x41   :  { %984 = vmatprep.mubr.f32.mxu0 %v30_v56  ;;  %1032 = vmatprep.mubr.f32.mxu1 %v62_v57 }
  0x44   :  { %985 = vmatmul.mubr.f32.gmra.mrb[16].mxu0 %v31_v58  ;;  %1033 = vmatmul.mubr.f32.gmra.mrb[16].mxu1 %v63_v59 }
  0x45   :  { %987 = vmatprep.mubr.f32.mxu0 %v32_v60  ;;  %1035 = vmatprep.mubr.f32.mxu1 %v64_v61 }
  0x48   :  { %988 = vmatmul.mubr.f32.gmra.mrb[18].mxu0 %v33_v62  ;;  %1036 = vmatmul.mubr.f32.gmra.mrb[18].mxu1 %v65_v63 }
  0x49   :  { %990 = vmatprep.mubr.f32.mxu0 %v34_v0  ;;  %1038 = vmatprep.mubr.f32.mxu1 %v66_v1 }
  0x4c   :  { %991 = vmatmul.mubr.f32.gmra.mrb[20].mxu0 %v35_v2  ;;  %1039 = vmatmul.mubr.f32.gmra.mrb[20].mxu1 %v67_v3 }
  0x4d   :  { %993 = vmatprep.mubr.f32.mxu0 %v36_v4  ;;  %1041 = vmatprep.mubr.f32.mxu1 %v68_v5 }
  0x50   :  { %994 = vmatmul.mubr.f32.gmra.mrb[22].mxu0 %v37_v6  ;;  %1042 = vmatmul.mubr.f32.gmra.mrb[22].mxu1 %v69_v7 }
  0x51   :  { %996 = vmatprep.mubr.f32.mxu0 %v38_v8  ;;  %1044 = vmatprep.mubr.f32.mxu1 %v70_v9 }
  0x54   :  { %997 = vmatmul.mubr.f32.gmra.mrb[24].mxu0 %v39_v10  ;;  %1045 = vmatmul.mubr.f32.gmra.mrb[24].mxu1 %v71_v11 }
  0x55   :  { %999 = vmatprep.mubr.f32.mxu0 %v40_v12  ;;  %1047 = vmatprep.mubr.f32.mxu1 %v72_v13 }
  0x58   :  { %1000 = vmatmul.mubr.f32.gmra.mrb[26].mxu0 %v41_v14  ;;  %1048 = vmatmul.mubr.f32.gmra.mrb[26].mxu1 %v73_v15 }
  0x59   :  { %1002 = vmatprep.mubr.f32.mxu0 %v42_v16  ;;  %1050 = vmatprep.mubr.f32.mxu1 %v74_v17 }
  0x5c   :  { %1003 = vmatmul.mubr.f32.gmra.mrb[28].mxu0 %v43_v18  ;;  %1051 = vmatmul.mubr.f32.gmra.mrb[28].mxu1 %v75_v19 }
  0x5d   :  { %1005 = vmatprep.mubr.f32.mxu0 %v44_v20  ;;  %1053 = vmatprep.mubr.f32.mxu1 %v76_v21 }
  0x60   :  { %1006 = vmatmul.mubr.f32.gmra.mrb[30].mxu0 %v45_v22  ;;  %1054 = vmatmul.mubr.f32.gmra.mrb[30].mxu1 %v77_v23 }
  0xf7   :  { %v1371_v24 = vpop.f32.mrb[0].mxu0  ;;  %v1373_v25 = vpop.f32.mrb[0].mxu1 }
  0xf8   :  { %v1375_v26 = vpop.f32.mrb[1].mxu0  ;;  %v1377_v27 = vpop.f32.mrb[1].mxu1 }
  0xf9   :  { %1893 = vst [vmem:[#allocation2_spill] sm:$0xff] %v1377_v27  ;;  %v483_v28 = vadd.f32 %v1371_v24, %v1375_v26 }
  0xfb   :  { %v1381_v29 = vpop.f32.mrb[2].mxu0  ;;  %v1383_v30 = vpop.f32.mrb[2].mxu1 }
  0xfc   :  { %v1385_v31 = vpop.f32.mrb[3].mxu0  ;;  %v1387_v32 = vpop.f32.mrb[3].mxu1 }
  0xfd   :  { %v484_v33 = vadd.f32 %v483_v28, %v1385_v31 }
  0xff   :  { %v1390_v34 = vpop.f32.mrb[4].mxu0  ;;  %v485_v35 = vadd.f32 %v1381_v29, %v484_v33  ;;  %v1393_v36 = vpop.f32.mrb[4].mxu1 }
 0x100   :  { %v1395_v37 = vpop.f32.mrb[5].mxu0  ;;  %v1397_v38 = vpop.f32.mrb[5].mxu1 }
 0x101   :  { %v486_v39 = vadd.f32 %v485_v35, %v1395_v37 }
 0x103   :  { %v1400_v40 = vpop.f32.mrb[6].mxu0  ;;  %v487_v41 = vadd.f32 %v1390_v34, %v486_v39  ;;  %v1403_v42 = vpop.f32.mrb[6].mxu1 }
 0x104   :  { %v1405_v43 = vpop.f32.mrb[7].mxu0  ;;  %v1407_v44 = vpop.f32.mrb[7].mxu1 }
 0x105   :  { %v488_v45 = vadd.f32 %v487_v41, %v1405_v43 }
 0x107   :  { %v1410_v46 = vpop.f32.mrb[8].mxu0  ;;  %v489_v47 = vadd.f32 %v1400_v40, %v488_v45  ;;  %v1413_v48 = vpop.f32.mrb[8].mxu1 }
 0x108   :  { %v1415_v49 = vpop.f32.mrb[9].mxu0  ;;  %v1417_v50 = vpop.f32.mrb[9].mxu1 }
 0x109   :  { %v490_v52 = vadd.f32 %v489_v47, %v1415_v49 }
 0x10b   :  { %v1426_v53 = vpop.f32.mrb[10].mxu0  ;;  %v491_v54 = vadd.f32 %v1410_v46, %v490_v52  ;;  %v1429_v55 = vpop.f32.mrb[10].mxu1 }
 0x10c   :  { %v1431_v56 = vpop.f32.mrb[11].mxu0  ;;  %v1433_v57 = vpop.f32.mrb[11].mxu1 }
 0x10d   :  { %v492_v58 = vadd.f32 %v491_v54, %v1431_v56 }
 0x10f   :  { %v1436_v59 = vpop.f32.mrb[12].mxu0  ;;  %v493_v60 = vadd.f32 %v1426_v53, %v492_v58  ;;  %v1439_v61 = vpop.f32.mrb[12].mxu1 }
 0x110   :  { %v1441_v62 = vpop.f32.mrb[13].mxu0  ;;  %v1443_v63 = vpop.f32.mrb[13].mxu1 }
 0x111   :  { %v494_v0 = vadd.f32 %v493_v60, %v1441_v62 }
 0x113   :  { %v1446_v1 = vpop.f32.mrb[14].mxu0  ;;  %v495_v2 = vadd.f32 %v1436_v59, %v494_v0  ;;  %v1449_v3 = vpop.f32.mrb[14].mxu1 }
 0x114   :  { %v1451_v4 = vpop.f32.mrb[15].mxu0  ;;  %v1453_v5 = vpop.f32.mrb[15].mxu1 }
 0x115   :  { %v496_v6 = vadd.f32 %v495_v2, %v1451_v4 }
 0x117   :  { %v1456_v7 = vpop.f32.mrb[16].mxu0  ;;  %v497_v8 = vadd.f32 %v1446_v1, %v496_v6  ;;  %v1459_v9 = vpop.f32.mrb[16].mxu1 }
 0x118   :  { %v1461_v10 = vpop.f32.mrb[17].mxu0  ;;  %v1463_v11 = vpop.f32.mrb[17].mxu1 }
 0x119   :  { %v498_v12 = vadd.f32 %v497_v8, %v1461_v10 }
 0x11b   :  { %v1466_v13 = vpop.f32.mrb[18].mxu0  ;;  %v499_v14 = vadd.f32 %v1456_v7, %v498_v12  ;;  %v1469_v15 = vpop.f32.mrb[18].mxu1 }
 0x11c   :  { %1894 = vst [vmem:[#allocation3_spill] sm:$0xff] %v1466_v13  ;;  %v1471_v16 = vpop.f32.mrb[19].mxu0  ;;  %v1473_v17 = vpop.f32.mrb[19].mxu1 }
 0x11d   :  { %1895 = vst [vmem:[#allocation4_spill] sm:$0xff] %v1471_v16  ;;  %v500_v18 = vadd.f32 %v499_v14, %v1471_v16 }
 0x11f   :  { %v1476_v19 = vpop.f32.mrb[20].mxu0  ;;  %v501_v20 = vadd.f32 %v1466_v13, %v500_v18  ;;  %v1479_v21 = vpop.f32.mrb[20].mxu1 }
 0x120   :  { %1896 = vst [vmem:[#allocation5_spill] sm:$0xff] %v1476_v19  ;;  %v1481_v22 = vpop.f32.mrb[21].mxu0  ;;  %v1483_v23 = vpop.f32.mrb[21].mxu1 }
 0x121   :  { %1897 = vst [vmem:[#allocation6_spill] sm:$0xff] %v1481_v22  ;;  %v502_v28 = vadd.f32 %v501_v20, %v1481_v22 }
 0x123   :  { %v1486_v33 = vpop.f32.mrb[22].mxu0  ;;  %v503_v35 = vadd.f32 %v1476_v19, %v502_v28  ;;  %v1489_v39 = vpop.f32.mrb[22].mxu1 }
 0x124   :  { %1898 = vst [vmem:[#allocation7_spill] sm:$0xff] %v1486_v33  ;;  %v1491_v41 = vpop.f32.mrb[23].mxu0  ;;  %v1493_v45 = vpop.f32.mrb[23].mxu1 }
 0x125   :  { %1899 = vst [vmem:[#allocation8_spill] sm:$0xff] %v1491_v41  ;;  %v504_v47 = vadd.f32 %v503_v35, %v1491_v41 }
 0x127   :  { %v1496_v51 = vpop.f32.mrb[24].mxu0  ;;  %v505_v52 = vadd.f32 %v1486_v33, %v504_v47  ;;  %v1499_v54 = vpop.f32.mrb[24].mxu1 }
 0x128   :  { %1900 = vst [vmem:[#allocation9_spill] sm:$0xff] %v1496_v51  ;;  %v1501_v58 = vpop.f32.mrb[25].mxu0  ;;  %v1503_v60 = vpop.f32.mrb[25].mxu1 }
 0x129   :  { %1901 = vst [vmem:[#allocation10_spill] sm:$0xff] %v1501_v58  ;;  %v506_v0 = vadd.f32 %v505_v52, %v1501_v58 }
 0x12b   :  { %v1506_v2 = vpop.f32.mrb[26].mxu0  ;;  %v507_v6 = vadd.f32 %v1496_v51, %v506_v0  ;;  %v1509_v8 = vpop.f32.mrb[26].mxu1 }
 0x12c   :  { %1902 = vst [vmem:[#allocation11_spill] sm:$0xff] %v1506_v2  ;;  %v1511_v12 = vpop.f32.mrb[27].mxu0  ;;  %v1513_v14 = vpop.f32.mrb[27].mxu1 }
 0x12d   :  { %1903 = vst [vmem:[#allocation12_spill] sm:$0xff] %v1511_v12  ;;  %v508_v18 = vadd.f32 %v507_v6, %v1511_v12 }
 0x12f   :  { %v1516_v20 = vpop.f32.mrb[28].mxu0  ;;  %v509_v28 = vadd.f32 %v1506_v2, %v508_v18  ;;  %v1519_v35 = vpop.f32.mrb[28].mxu1 }
 0x130   :  { %1904 = vst [vmem:[#allocation13_spill] sm:$0xff] %v1516_v20  ;;  %v1521_v47 = vpop.f32.mrb[29].mxu0  ;;  %v1523_v52 = vpop.f32.mrb[29].mxu1 }
 0x131   :  { %1905 = vst [vmem:[#allocation14_spill] sm:$0xff] %v1521_v47  ;;  %v510_v0 = vadd.f32 %v509_v28, %v1521_v47 }
 0x133   :  { %v1526_v51 = vpop.f32.mrb[30].mxu0  ;;  %v511_v58 = vadd.f32 %v1516_v20, %v510_v0  ;;  %v1529_v33 = vpop.f32.mrb[30].mxu1 }
 0x134   :  { %1906 = vst [vmem:[#allocation15_spill] sm:$0xff] %v1526_v51  ;;  %v1531_v41 = vpop.f32.mrb[31].mxu0  ;;  %v1533_v6 = vpop.f32.mrb[31].mxu1 }
 0x135   :  { %1907 = vst [vmem:[#allocation16_spill] sm:$0xff] %v1531_v41  ;;  %v512_v18 = vadd.f32 %v511_v58, %v1531_v41 }
 0x137   :  { %v513_v2 = vadd.f32 %v1526_v51, %v512_v18 }
 0x139   :  { %v514_v12 = vadd.f32 %v513_v2, %v1377_v27 }
 0x13b   :  { %v515_v19 = vadd.f32 %v1373_v25, %v514_v12 }
 0x13d   :  { %v516_v28 = vadd.f32 %v515_v19, %v1387_v32 }
 0x13f   :  { %v517_v47 = vadd.f32 %v1383_v30, %v516_v28 }
 0x141   :  { %v518_v0 = vadd.f32 %v517_v47, %v1397_v38 }
 0x143   :  { %v519_v20 = vadd.f32 %v1393_v36, %v518_v0 }
 0x145   :  { %v520_v22 = vadd.f32 %v519_v20, %v1407_v44 }
 0x147   :  { %v521_v13 = vadd.f32 %v1403_v42, %v520_v22 }
 0x149   :  { %v522_v58 = vadd.f32 %v521_v13, %v1417_v50 }
 0x14b   :  { %v523_v18 = vadd.f32 %v1413_v48, %v522_v58 }
 0x14d   :  { %v524_v2 = vadd.f32 %v523_v18, %v1433_v57 }
 0x14f   :  { %v525_v12 = vadd.f32 %v1429_v55, %v524_v2 }
 0x151   :  { %v526_v19 = vadd.f32 %v525_v12, %v1443_v63 }
 0x153   :  { %v527_v28 = vadd.f32 %v1439_v61, %v526_v19 }
 0x155   :  { %v528_v47 = vadd.f32 %v527_v28, %v1453_v5 }
 0x157   :  { %v529_v0 = vadd.f32 %v1449_v3, %v528_v47 }
 0x159   :  { %v530_v20 = vadd.f32 %v529_v0, %v1463_v11 }
 0x15b   :  { %v531_v22 = vadd.f32 %v1459_v9, %v530_v20 }
 0x15d   :  { %v532_v13 = vadd.f32 %v531_v22, %v1473_v17 }
 0x15f   :  { %v533_v58 = vadd.f32 %v1469_v15, %v532_v13 }
 0x161   :  { %v534_v18 = vadd.f32 %v533_v58, %v1483_v23 }
 0x163   :  { %v535_v2 = vadd.f32 %v1479_v21, %v534_v18 }
 0x165   :  { %v536_v12 = vadd.f32 %v535_v2, %v1493_v45 }
 0x167   :  { %v537_v19 = vadd.f32 %v1489_v39, %v536_v12 }
 0x169   :  { %v538_v28 = vadd.f32 %v537_v19, %v1503_v60 }
 0x16b   :  { %v539_v47 = vadd.f32 %v1499_v54, %v538_v28 }
 0x16d   :  { %v540_v0 = vadd.f32 %v539_v47, %v1513_v14 }
 0x16f   :  { %v541_v20 = vadd.f32 %v1509_v8, %v540_v0 }
 0x171   :  { %v542_v22 = vadd.f32 %v541_v20, %v1523_v52 }
 0x173   :  { %v543_v13 = vadd.f32 %v1519_v35, %v542_v22 }
 0x175   :  { %v544_v58 = vadd.f32 %v543_v13, %v1533_v6 }
 0x177   :  { %v545_v18 = vadd.f32 %v1529_v33, %v544_v58 }
 0x179   :  { %v546_v27 = vrot.slane %v545_v18, 4 }
 0x17b   :  { %v547_v2 = vadd.f32 %v546_v27, %v545_v18 }
 0x17d   :  { %v548_v51 = vrot.slane %v547_v2, 2 }
 0x17f   :  { %v549_v12 = vadd.f32 %v548_v51, %v547_v2 }
 0x181   :  { %v550_v41 = vrot.slane %v549_v12, 1 }
 0x183   :  { %v551_v19 = vadd.f32 %v550_v41, %v549_v12 }
 0x185   :  { %v552_v16 = vmul.f32 0.001953125, %v551_v19 }
 0x187   :  { %553 = vst [vmem:[%s1876_s2] sm:$0x1] %v552_v16 }
 0x18e   :  { %v1575_v28 = vld [vmem:[%s1876_s2] ss:$0 sm:$0xff] }
 0x18f   :  { %v563_v47 = vsub.f32 %v1375_v26, %v1575_v28  ;;  %v564_v27 = vsub.f32 %v1371_v24, %v1575_v28  ;;  %v1583_v51 = vsub.f32 %v1373_v25, %v1575_v28  ;;  %v1587_v41 = vsub.f32 %v1387_v32, %v1575_v28 }
 0x190   :  { %v1591_v16 = vsub.f32 %v1383_v30, %v1575_v28  ;;  %v1595_v0 = vsub.f32 %v1397_v38, %v1575_v28  ;;  %v1599_v26 = vsub.f32 %v1393_v36, %v1575_v28  ;;  %v1603_v24 = vsub.f32 %v1407_v44, %v1575_v28 }
 0x191   :  { %v1607_v25 = vsub.f32 %v1403_v42, %v1575_v28  ;;  %v1611_v30 = vsub.f32 %v1417_v50, %v1575_v28  ;;  %v1615_v32 = vsub.f32 %v1413_v48, %v1575_v28  ;;  %v1619_v36 = vsub.f32 %v1433_v57, %v1575_v28 }
 0x192   :  { %v1623_v38 = vsub.f32 %v1429_v55, %v1575_v28  ;;  %v1627_v42 = vsub.f32 %v1443_v63, %v1575_v28  ;;  %v1631_v44 = vsub.f32 %v1439_v61, %v1575_v28  ;;  %v1635_v48 = vsub.f32 %v1453_v5, %v1575_v28 }
 0x193   :  { %v1639_v50 = vsub.f32 %v1449_v3, %v1575_v28  ;;  %v1643_v55 = vsub.f32 %v1463_v11, %v1575_v28  ;;  %v1647_v57 = vsub.f32 %v1459_v9, %v1575_v28  ;;  %v1651_v61 = vsub.f32 %v1473_v17, %v1575_v28 }
 0x194   :  { %v1655_v63 = vsub.f32 %v1469_v15, %v1575_v28  ;;  %v1659_v3 = vsub.f32 %v1483_v23, %v1575_v28  ;;  %v1663_v5 = vsub.f32 %v1479_v21, %v1575_v28  ;;  %v1667_v9 = vsub.f32 %v1493_v45, %v1575_v28 }
 0x195   :  { %v1671_v11 = vsub.f32 %v1489_v39, %v1575_v28  ;;  %v1675_v15 = vsub.f32 %v1503_v60, %v1575_v28  ;;  %v1679_v17 = vsub.f32 %v1499_v54, %v1575_v28  ;;  %v1683_v21 = vsub.f32 %v1513_v14, %v1575_v28 }
 0x196   :  { %v1687_v23 = vsub.f32 %v1509_v8, %v1575_v28  ;;  %v1691_v39 = vsub.f32 %v1523_v52, %v1575_v28  ;;  %v1695_v45 = vsub.f32 %v1519_v35, %v1575_v28  ;;  %v1699_v54 = vsub.f32 %v1533_v6, %v1575_v28 }
 0x197   :  { %v1703_v60 = vsub.f32 %v1529_v33, %v1575_v28  ;;  %v565_v8 = vsub.f32 %v1385_v31, %v1575_v28  ;;  %v628_v14 = vadd.f32 %v564_v27, %v563_v47  ;;  %v566_v52 = vsub.f32 %v1381_v29, %v1575_v28 }
 0x198   :  { %v567_v35 = vsub.f32 %v1395_v37, %v1575_v28  ;;  %v568_v6 = vsub.f32 %v1390_v34, %v1575_v28  ;;  %v569_v33 = vsub.f32 %v1405_v43, %v1575_v28  ;;  %v570_v31 = vsub.f32 %v1400_v40, %v1575_v28 }
 0x199   :  { %1908 = vst [vmem:[#allocation17_spill] sm:$0xff] %v1703_v60  ;;  %v629_v20 = vadd.f32 %v628_v14, %v565_v8  ;;  %v571_v29 = vsub.f32 %v1415_v49, %v1575_v28  ;;  %v572_v37 = vsub.f32 %v1410_v46, %v1575_v28  ;;  %v700_v19 = vmul.f32 %v563_v47, %v563_v47 }
 0x19a   :  { %v701_v14 = vmul.f32 %v564_v27, %v564_v27  ;;  %v573_v34 = vsub.f32 %v1431_v56, %v1575_v28  ;;  %v574_v43 = vsub.f32 %v1426_v53, %v1575_v28  ;;  %v702_v40 = vmul.f32 %v565_v8, %v565_v8 }
 0x19b   :  { %v630_v22 = vadd.f32 %v629_v20, %v566_v52  ;;  %v575_v49 = vsub.f32 %v1441_v62, %v1575_v28  ;;  %v576_v46 = vsub.f32 %v1436_v59, %v1575_v28  ;;  %v704_v27 = vmul.f32 %v567_v35, %v567_v35 }
 0x19c   :  { %v577_v56 = vsub.f32 %v1451_v4, %v1575_v28  ;;  %v705_v53 = vmul.f32 %v568_v6, %v568_v6  ;;  %v578_v8 = vsub.f32 %v1446_v1, %v1575_v28  ;;  %v706_v62 = vmul.f32 %v569_v33, %v569_v33 }
 0x19d   :  { %v631_v13 = vadd.f32 %v630_v22, %v567_v35  ;;  %v707_v59 = vmul.f32 %v570_v31, %v570_v31  ;;  %v708_v4 = vmul.f32 %v571_v29, %v571_v29  ;;  %v709_v1 = vmul.f32 %v572_v37, %v572_v37 }
 0x19f   :  { %v632_v58 = vadd.f32 %v631_v13, %v568_v6  ;;  %v764_v13 = vadd.f32 %v701_v14, %v700_v19  ;;  %v1909_v6 = vld [vmem:[#allocation4_spill] sm:$0xff] }
 0x1a1   :  { %v633_v18 = vadd.f32 %v632_v58, %v569_v33  ;;  %v765_v60 = vadd.f32 %v764_v13, %v702_v40  ;;  %v1910_v33 = vld [vmem:[#allocation3_spill] sm:$0xff] }
 0x1a3   :  { %v634_v2 = vadd.f32 %v633_v18, %v570_v31  ;;  %v703_v18 = vmul.f32 %v566_v52, %v566_v52  ;;  %v579_v52 = vsub.f32 %v1461_v10, %v1575_v28  ;;  %v710_v10 = vmul.f32 %v573_v34, %v573_v34  ;;  %v1911_v31 = vld [vmem:[#allocation6_spill] sm:$0xff] }
 0x1a5   :  { %v635_v12 = vadd.f32 %v634_v2, %v571_v29  ;;  %v766_v2 = vadd.f32 %v765_v60, %v703_v18  ;;  %v580_v60 = vsub.f32 %v1456_v7, %v1575_v28  ;;  %v711_v7 = vmul.f32 %v574_v43, %v574_v43  ;;  %v1912_v29 = vld [vmem:[#allocation5_spill] sm:$0xff] }
 0x1a7   :  { %v636_v20 = vadd.f32 %v635_v12, %v572_v37  ;;  %v1913_v37 = vld [vmem:[#allocation8_spill] sm:$0xff] }
 0x1a9   :  { %v637_v22 = vadd.f32 %v636_v20, %v573_v34  ;;  %v767_v20 = vadd.f32 %v766_v2, %v704_v27  ;;  %v582_v27 = vsub.f32 %v1910_v33, %v1575_v28  ;;  %v1914_v34 = vld [vmem:[#allocation7_spill] sm:$0xff] }
 0x1ab   :  { %v638_v58 = vadd.f32 %v637_v22, %v574_v43  ;;  %v768_v14 = vadd.f32 %v767_v20, %v705_v53  ;;  %v583_v53 = vsub.f32 %v1911_v31, %v1575_v28  ;;  %v1915_v43 = vld [vmem:[#allocation10_spill] sm:$0xff] }
 0x1ac   :  { %v587_v33 = vsub.f32 %v1915_v43, %v1575_v28 }
 0x1ad   :  { %v639_v47 = vadd.f32 %v638_v58, %v575_v49  ;;  %v769_v40 = vadd.f32 %v768_v14, %v706_v62  ;;  %v581_v58 = vsub.f32 %v1909_v6, %v1575_v28  ;;  %v584_v62 = vsub.f32 %v1912_v29, %v1575_v28 }
 0x1ae   :  { %v586_v6 = vsub.f32 %v1914_v34, %v1575_v28 }
 0x1af   :  { %v640_v12 = vadd.f32 %v639_v47, %v576_v46  ;;  %v770_v13 = vadd.f32 %v769_v40, %v707_v59  ;;  %v585_v40 = vsub.f32 %v1913_v37, %v1575_v28 }
 0x1b1   :  { %v641_v19 = vadd.f32 %v640_v12, %v577_v56  ;;  %v771_v47 = vadd.f32 %v770_v13, %v708_v4  ;;  %v713_v4 = vmul.f32 %v576_v46, %v576_v46  ;;  %v1917_v46 = vld [vmem:[#allocation12_spill] sm:$0xff] }
 0x1b2   :  { %v589_v29 = vsub.f32 %v1917_v46, %v1575_v28 }
 0x1b3   :  { %v642_v22 = vadd.f32 %v641_v19, %v578_v8  ;;  %v772_v12 = vadd.f32 %v771_v47, %v709_v1  ;;  %v714_v1 = vmul.f32 %v577_v56, %v577_v56  ;;  %v1918_v56 = vld [vmem:[#allocation11_spill] sm:$0xff] }
 0x1b4   :  { %v590_v37 = vsub.f32 %v1918_v56, %v1575_v28 }
 0x1b5   :  { %v643_v35 = vadd.f32 %v642_v22, %v579_v52  ;;  %v773_v19 = vadd.f32 %v772_v12, %v710_v10  ;;  %v712_v22 = vmul.f32 %v575_v49, %v575_v49  ;;  %v715_v10 = vmul.f32 %v578_v8, %v578_v8  ;;  %v1916_v49 = vld [vmem:[#allocation9_spill] sm:$0xff]  ;;  %v1919_v8 = vld [vmem:[#allocation14_spill] sm:$0xff] }
 0x1b6   :  { %v588_v31 = vsub.f32 %v1916_v49, %v1575_v28  ;;  %v591_v34 = vsub.f32 %v1919_v8, %v1575_v28  ;;  %v724_v8 = vmul.f32 %v587_v33, %v587_v33 }
 0x1b7   :  { %v644_v18 = vadd.f32 %v643_v35, %v580_v60  ;;  %v774_v59 = vadd.f32 %v773_v19, %v711_v7  ;;  %v716_v7 = vmul.f32 %v579_v52, %v579_v52  ;;  %v1920_v52 = vld [vmem:[#allocation13_spill] sm:$0xff] }
 0x1b8   :  { %v592_v43 = vsub.f32 %v1920_v52, %v1575_v28 }
 0x1b9   :  { %v645_v2 = vadd.f32 %v644_v18, %v581_v58  ;;  %v775_v13 = vadd.f32 %v774_v59, %v712_v22  ;;  %v717_v22 = vmul.f32 %v580_v60, %v580_v60  ;;  %v1921_v60 = vld [vmem:[#allocation16_spill] sm:$0xff] }
 0x1ba   :  { %v593_v49 = vsub.f32 %v1921_v60, %v1575_v28 }
 0x1bb   :  { %v646_v20 = vadd.f32 %v645_v2, %v582_v27  ;;  %v776_v47 = vadd.f32 %v775_v13, %v713_v4  ;;  %v718_v4 = vmul.f32 %v581_v58, %v581_v58  ;;  %v1922_v58 = vld [vmem:[#allocation15_spill] sm:$0xff] }
 0x1bc   :  { %v594_v46 = vsub.f32 %v1922_v58, %v1575_v28 }
 0x1bd   :  { %v647_v14 = vadd.f32 %v646_v20, %v583_v53  ;;  %v777_v12 = vadd.f32 %v776_v47, %v714_v1  ;;  %v719_v1 = vmul.f32 %v582_v27, %v582_v27  ;;  %v1923_v27 = vld [vmem:[#allocation2_spill] sm:$0xff] }
 0x1be   :  { %v595_v56 = vsub.f32 %v1923_v27, %v1575_v28 }
 0x1bf   :  { %v648_v35 = vadd.f32 %v647_v14, %v584_v62  ;;  %v778_v19 = vadd.f32 %v777_v12, %v715_v10  ;;  %v720_v10 = vmul.f32 %v583_v53, %v583_v53 }
 0x1c1   :  { %v649_v18 = vadd.f32 %v648_v35, %v585_v40  ;;  %v779_v59 = vadd.f32 %v778_v19, %v716_v7  ;;  %v721_v7 = vmul.f32 %v584_v62, %v584_v62 }
 0x1c3   :  { %v650_v2 = vadd.f32 %v649_v18, %v586_v6  ;;  %v780_v13 = vadd.f32 %v779_v59, %v717_v22  ;;  %v722_v22 = vmul.f32 %v585_v40, %v585_v40 }
 0x1c5   :  { %v651_v20 = vadd.f32 %v650_v2, %v587_v33  ;;  %v781_v47 = vadd.f32 %v780_v13, %v718_v4  ;;  %v723_v4 = vmul.f32 %v586_v6, %v586_v6  ;;  %v729_v33 = vmul.f32 %v592_v43, %v592_v43 }
 0x1c7   :  { %v652_v14 = vadd.f32 %v651_v20, %v588_v31  ;;  %v782_v12 = vadd.f32 %v781_v47, %v719_v1  ;;  %v725_v47 = vmul.f32 %v588_v31, %v588_v31  ;;  %v730_v31 = vmul.f32 %v593_v49, %v593_v49 }
 0x1c9   :  { %v653_v35 = vadd.f32 %v652_v14, %v589_v29  ;;  %v783_v19 = vadd.f32 %v782_v12, %v720_v10  ;;  %v727_v12 = vmul.f32 %v590_v37, %v590_v37 }
 0x1cb   :  { %v654_v18 = vadd.f32 %v653_v35, %v590_v37  ;;  %v784_v59 = vadd.f32 %v783_v19, %v721_v7  ;;  %v732_v37 = vmul.f32 %v595_v56, %v595_v56 }
 0x1cd   :  { %v655_v2 = vadd.f32 %v654_v18, %v591_v34  ;;  %v785_v13 = vadd.f32 %v784_v59, %v722_v22 }
 0x1cf   :  { %v656_v20 = vadd.f32 %v655_v2, %v592_v43  ;;  %v786_v18 = vadd.f32 %v785_v13, %v723_v4  ;;  %v726_v2 = vmul.f32 %v589_v29, %v589_v29  ;;  %v731_v29 = vmul.f32 %v594_v46, %v594_v46 }
 0x1d1   :  { %v657_v14 = vadd.f32 %v656_v20, %v593_v49  ;;  %v787_v62 = vadd.f32 %v786_v18, %v724_v8  ;;  %v728_v20 = vmul.f32 %v591_v34, %v591_v34  ;;  %v733_v34 = vmul.f32 %v1583_v51, %v1583_v51 }
 0x1d2   :  { %v734_v49 = vmul.f32 %v1587_v41, %v1587_v41 }
 0x1d3   :  { %v658_v35 = vadd.f32 %v657_v14, %v594_v46  ;;  %v788_v10 = vadd.f32 %v787_v62, %v725_v47  ;;  %v735_v46 = vmul.f32 %v1591_v16, %v1591_v16  ;;  %v737_v62 = vmul.f32 %v1599_v26, %v1599_v26 }
 0x1d5   :  { %v659_v53 = vadd.f32 %v658_v35, %v595_v56  ;;  %v789_v60 = vadd.f32 %v788_v10, %v726_v2  ;;  %v738_v2 = vmul.f32 %v1603_v24, %v1603_v24 }
 0x1d7   :  { %v660_v1 = vadd.f32 %v659_v53, %v1583_v51  ;;  %v790_v6 = vadd.f32 %v789_v60, %v727_v12  ;;  %v740_v60 = vmul.f32 %v1611_v30, %v1611_v30 }
 0x1d9   :  { %v661_v52 = vadd.f32 %v660_v1, %v1587_v41  ;;  %v791_v19 = vadd.f32 %v790_v6, %v728_v20  ;;  %v736_v1 = vmul.f32 %v1595_v0, %v1595_v0  ;;  %v741_v20 = vmul.f32 %v1615_v32, %v1615_v32 }
 0x1db   :  { %v662_v40 = vadd.f32 %v661_v52, %v1591_v16  ;;  %v792_v14 = vadd.f32 %v791_v19, %v729_v33  ;;  %v743_v19 = vmul.f32 %v1623_v38, %v1623_v38 }
 0x1dd   :  { %v663_v28 = vadd.f32 %v662_v40, %v1595_v0  ;;  %v793_v59 = vadd.f32 %v792_v14, %v730_v31  ;;  %v739_v40 = vmul.f32 %v1607_v25, %v1607_v25  ;;  %v744_v31 = vmul.f32 %v1627_v42, %v1627_v42 }
 0x1df   :  { %v664_v7 = vadd.f32 %v663_v28, %v1599_v26  ;;  %v794_v35 = vadd.f32 %v793_v59, %v731_v29  ;;  %v746_v59 = vmul.f32 %v1635_v48, %v1635_v48 }
 0x1e1   :  { %v665_v58 = vadd.f32 %v664_v7, %v1603_v24  ;;  %v795_v13 = vadd.f32 %v794_v35, %v732_v37  ;;  %v742_v7 = vmul.f32 %v1619_v36, %v1619_v36  ;;  %v747_v37 = vmul.f32 %v1639_v50, %v1639_v50 }
 0x1e3   :  { %v666_v22 = vadd.f32 %v665_v58, %v1607_v25  ;;  %v796_v53 = vadd.f32 %v795_v13, %v733_v34  ;;  %v749_v13 = vmul.f32 %v1647_v57, %v1647_v57 }
 0x1e5   :  { %v667_v27 = vadd.f32 %v666_v22, %v1611_v30  ;;  %v797_v18 = vadd.f32 %v796_v53, %v734_v49  ;;  %v745_v22 = vmul.f32 %v1631_v44, %v1631_v44  ;;  %v750_v49 = vmul.f32 %v1651_v61, %v1651_v61 }
 0x1e7   :  { %v668_v4 = vadd.f32 %v667_v27, %v1615_v32  ;;  %v798_v47 = vadd.f32 %v797_v18, %v735_v46  ;;  %v752_v18 = vmul.f32 %v1659_v3, %v1659_v3 }
 0x1e9   :  { %v669_v43 = vadd.f32 %v668_v4, %v1619_v36  ;;  %v799_v52 = vadd.f32 %v798_v47, %v736_v1  ;;  %v748_v4 = vmul.f32 %v1643_v55, %v1643_v55  ;;  %v753_v1 = vmul.f32 %v1663_v5, %v1663_v5 }
 0x1eb   :  { %v670_v8 = vadd.f32 %v669_v43, %v1623_v38  ;;  %v800_v10 = vadd.f32 %v799_v52, %v737_v62 }
 0x1ed   :  { %v671_v56 = vadd.f32 %v670_v8, %v1627_v42  ;;  %v801_v12 = vadd.f32 %v800_v10, %v738_v2  ;;  %v751_v8 = vmul.f32 %v1655_v63, %v1655_v63  ;;  %v756_v10 = vmul.f32 %v1675_v15, %v1675_v15 }
 0x1ef   :  { %v672_v51 = vadd.f32 %v671_v56, %v1631_v44  ;;  %v802_v28 = vadd.f32 %v801_v12, %v739_v40 }
 0x1f1   :  { %v673_v41 = vadd.f32 %v672_v51, %v1635_v48  ;;  %v803_v6 = vadd.f32 %v802_v28, %v740_v60  ;;  %v754_v51 = vmul.f32 %v1667_v9, %v1667_v9 }
 0x1f3   :  { %v674_v16 = vadd.f32 %v673_v41, %v1639_v50  ;;  %v804_v33 = vadd.f32 %v803_v6, %v741_v20  ;;  %v755_v41 = vmul.f32 %v1671_v11, %v1671_v11 }
 0x1f5   :  { %v675_v0 = vadd.f32 %v674_v16, %v1643_v55  ;;  %v805_v58 = vadd.f32 %v804_v33, %v742_v7  ;;  %v761_v7 = vmul.f32 %v1695_v45, %v1695_v45 }
 0x1f7   :  { %v676_v26 = vadd.f32 %v675_v0, %v1647_v57  ;;  %v806_v14 = vadd.f32 %v805_v58, %v743_v19 }
 0x1f9   :  { %v677_v24 = vadd.f32 %v676_v26, %v1651_v61  ;;  %v807_v29 = vadd.f32 %v806_v14, %v744_v31 }
 0x1fb   :  { %v678_v25 = vadd.f32 %v677_v24, %v1655_v63  ;;  %v808_v27 = vadd.f32 %v807_v29, %v745_v22  ;;  %v1924_v63 = vld [vmem:[#allocation17_spill] sm:$0xff]  ;;  %v699_v22 = vld [vmem:[%s1875_s4] sm:$0x1] }
 0x1fd   :  { %v679_v30 = vadd.f32 %v678_v25, %v1659_v3  ;;  %v809_v35 = vadd.f32 %v808_v27, %v746_v59  ;;  %v762_v25 = vmul.f32 %v1699_v54, %v1699_v54 }
 0x1ff   :  { %v680_v32 = vadd.f32 %v679_v30, %v1663_v5  ;;  %v810_v34 = vadd.f32 %v809_v35, %v747_v37  ;;  %v757_v5 = vmul.f32 %v1679_v17, %v1679_v17 }
 0x201   :  { %v681_v36 = vadd.f32 %v680_v32, %v1667_v9  ;;  %v811_v43 = vadd.f32 %v810_v34, %v748_v4  ;;  %v758_v9 = vmul.f32 %v1683_v21, %v1683_v21 }
 0x203   :  { %v682_v38 = vadd.f32 %v681_v36, %v1671_v11  ;;  %v812_v53 = vadd.f32 %v811_v43, %v749_v13  ;;  %v759_v11 = vmul.f32 %v1687_v23, %v1687_v23 }
 0x205   :  { %v683_v42 = vadd.f32 %v682_v38, %v1675_v15  ;;  %v813_v46 = vadd.f32 %v812_v53, %v750_v49  ;;  %v760_v15 = vmul.f32 %v1691_v39, %v1691_v39 }
 0x207   :  { %v684_v44 = vadd.f32 %v683_v42, %v1679_v17  ;;  %v814_v56 = vadd.f32 %v813_v46, %v751_v8  ;;  %v627_v17 = vld [vmem:[%s1874_s3] sm:$0x1] }
 0x209   :  { %v685_v48 = vadd.f32 %v684_v44, %v1683_v21  ;;  %v815_v47 = vadd.f32 %v814_v56, %v752_v18 }
 0x20b   :  { %v686_v50 = vadd.f32 %v685_v48, %v1687_v23  ;;  %v816_v62 = vadd.f32 %v815_v47, %v753_v1 }
 0x20d   :  { %v687_v55 = vadd.f32 %v686_v50, %v1691_v39  ;;  %v817_v2 = vadd.f32 %v816_v62, %v754_v51  ;;  %v763_v39 = vmul.f32 %v1924_v63, %v1924_v63 }
 0x20f   :  { %v688_v57 = vadd.f32 %v687_v55, %v1695_v45  ;;  %v818_v16 = vadd.f32 %v817_v2, %v755_v41 }
 0x211   :  { %v689_v61 = vadd.f32 %v688_v57, %v1699_v54  ;;  %v819_v12 = vadd.f32 %v818_v16, %v756_v10 }
 0x213   :  { %v690_v52 = vadd.f32 %v689_v61, %v1924_v63  ;;  %v820_v60 = vadd.f32 %v819_v12, %v757_v5 }
 0x215   :  { %v691_v3 = vrot.slane %v690_v52, 4  ;;  %v821_v26 = vadd.f32 %v820_v60, %v758_v9 }
 0x217   :  { %v692_v40 = vadd.f32 %v691_v3, %v690_v52  ;;  %v822_v6 = vadd.f32 %v821_v26, %v759_v11 }
 0x219   :  { %v693_v0 = vrot.slane %v692_v40, 2  ;;  %v823_v21 = vadd.f32 %v822_v6, %v760_v15 }
 0x21b   :  { %v694_v28 = vadd.f32 %v693_v0, %v692_v40  ;;  %v824_v23 = vadd.f32 %v823_v21, %v761_v7 }
 0x21d   :  { %v695_v20 = vrot.slane %v694_v28, 1  ;;  %v825_v19 = vadd.f32 %v824_v23, %v762_v25 }
 0x21f   :  { %v696_v24 = vadd.f32 %v695_v20, %v694_v28  ;;  %v826_v58 = vadd.f32 %v825_v19, %v763_v39 }
 0x221   :  { %v697_v33 = vadd.f32 %v696_v24, %v627_v17  ;;  %v827_v30 = vrot.slane %v826_v58, 4 }
 0x223   :  { %698 = vst [vmem:[%s1874_s3] sm:$0x1] %v697_v33  ;;  %v828_v31 = vadd.f32 %v827_v30, %v826_v58 }
 0x225   :  { %v829_v14 = vrot.slane %v828_v31, 2 }
 0x227   :  { %v830_v32 = vadd.f32 %v829_v14, %v828_v31 }
 0x229   :  { %v831_v45 = vrot.slane %v830_v32, 1 }
 0x22b   :  { %v832_v54 = vadd.f32 %v831_v45, %v830_v32 }
 0x22d   :  { %v833_v29 = vadd.f32 %v832_v54, %v699_v22 }
 0x22f   :  { %834 = vst [vmem:[%s1875_s4] sm:$0x1] %v833_v29 }

</bundles_post_ra>
